<compile_context>
chip_gen: v7x
topology: tpu7x:2x2x1
jax: 0.10.0
libtpu: 0.0.40
codegen_flags: <defaults>
</compile_context>

<pallas_src>
import functools
import math

import jax
import jax.numpy as jnp
from jax.experimental import pallas as pl
from jax.experimental.pallas import tpu as pltpu  # noqa: F401  (TPU backend)


def _vmem_full(shape):
    # Whole-array block resident in VMEM (all operands here are tiny).
    return pl.BlockSpec(shape, lambda: (0,) * len(shape))


# ------------------- in-kernel constant-generation helpers ------------------ #

def _iota_f(shape, dim):
    # f32 iota built from an int32 iota (the guaranteed-lowering path).
    return jax.lax.broadcasted_iota(jnp.int32, shape, dim).astype(jnp.float32)


def _fdiv(a, d):
    # floor(a / d) for small non-negative integer-valued f32 arrays (exact; the
    # +0.5/d margin keeps rounding away from integer boundaries for any small d).
    return jnp.floor((a + 0.5) * (1.0 / d))


def _fmod(a, d):
    return a - d * _fdiv(a, d)


def _mask(cond):
    return jnp.where(cond, jnp.float32(1.0), jnp.float32(0.0))


# ------------------------------ fused kernel ------------------------------- #

def _decoder_kernel(x_ref, w_all_ref, b_all_ref, wcat_ref, bcat_ref,
                    w_out_ref, b_out_ref, o_ref, *, n_head, inv_scale, eps):
    f32 = jnp.float32
    x = x_ref[...]                       # (L, Cin)
    L = x.shape[0]
    W4 = w_all_ref.shape[1]              # 4*H  ([q | k | v | wl] column blocks)
    H = W4 // 4
    dt = H // n_head                     # the module's d_tensor after split()
    Ld = L * dt

    # --- constant 0/1 selection matrices, generated on the VPU (no HBM inputs)
    r = _iota_f((Ld, L), 0); l = _iota_f((Ld, L), 1)
    exp_r = _mask(_fdiv(r, dt) == l)                        # (Ld, L): each token row replicated dt times
    l2 = _iota_f((L, Ld), 0); r2 = _iota_f((L, Ld), 1)
    col_r = _mask(_fdiv(r2, dt) == l2)                      # (L, Ld): collapse back to L rows

    ri = _iota_f((Ld, W4), 0); ci = _iota_f((Ld, W4), 1)
    msel4 = _mask(_fmod(ri, dt) == _fmod(ci, dt))           # (Ld, 4H): pick column i within each head
    ri2 = _iota_f((Ld, H), 0); ci2 = _iota_f((Ld, H), 1)
    msel = _mask(_fmod(ri2, dt) == _fmod(ci2, dt))          # (Ld, H)

    a = _iota_f((W4, W4), 0); b = _iota_f((W4, W4), 1)
    g_qk = _mask((a < H) & (b >= H) & (b < 2 * H)
                 & (_fdiv(a, dt) == _fdiv(b - H, dt)))      # q-block -> k-block head broadcast

    c = _iota_f((W4, dt), 0); j = _iota_f((W4, dt), 1)
    m_sum = jnp.where(_fmod(c, dt) == j,
                      f32(inv_scale), f32(0.0))             # (4H, dt), 1/sqrt(n_head) folded in

    j2 = _iota_f((dt, W4), 0); c2 = _iota_f((dt, W4), 1)
    m_bcast = _mask(_fmod(c2, dt) == j2)                    # (dt, 4H): broadcast p over column blocks

    cv = _iota_f((W4, H), 0); co = _iota_f((W4, H), 1)
    g_v = _mask((cv >= 2 * H) & (cv < 3 * H)
                & (_fdiv(cv - 2 * H, dt) == _fdiv(co, dt))) # v-block head-wise sum
    sel_l = _mask((cv - 3 * H) == co)                       # picks the wl block out of the projection

    # --- fused [wq | wk | wv | wl] projection: one lane-dense (Cin, 128) matmul
    proj = jnp.dot(x, w_all_ref[...], preferred_element_type=f32) + b_all_ref[...]   # (L, 4H)
    xl = jnp.dot(proj, sel_l, preferred_element_type=f32)                             # (L, H) = x @ wl + bl

    # --- expand to one row per (token, i) pair; q/k/v/wl stay packed in 4H lanes
    # TODO(synk): for production L drop this d_t-fold row expansion (per-head
    # masked (L, H) matmuls), add a ("parallel",) row-tile grid (2 TCs on v7x,
    # tiles re-derived for v7x's 64 MiB VMEM via pltpu.CompilerParams), batch
    # many sequences per call so the output last dim is a lane-dense multiple of
    # 128, and cast matmul operands to bf16 (fp8 on v7x, int8 on v5e/v6e) while
    # keeping softmax/LayerNorm elementwise math in f32.
    pe = jnp.dot(exp_r, proj, preferred_element_type=f32)                             # (Ld, 4H)

    # --- score[l,i,j] = 1/sqrt(n_head) * sum_h q[l,h*dt+i] * k[l,h*dt+j]
    # (the module's split() layout contracts over the head axis)
    tq = jnp.dot(pe * msel4, g_qk, preferred_element_type=f32)      # q broadcast into the k block
    s = jnp.dot(tq * pe, m_sum, preferred_element_type=f32)         # (Ld, dt), already scaled

    # softmax(dim=-1); normalisation reciprocal on the EUP
    m = jnp.max(s, axis=-1, keepdims=True)
    e = jnp.exp(s - m)
    p = e * pl.reciprocal(jnp.sum(e, axis=-1, keepdims=True), approx=True)

    # --- out[l,i,h] = sum_j p[l,i,j] * v[l,h*dt+j]; concat back to (L, H)
    pb = jnp.dot(p, m_bcast, preferred_element_type=f32)            # (Ld, 4H)
    wg = jnp.dot(pb * pe, g_v, preferred_element_type=f32)          # (Ld, H)
    cat = jnp.dot(col_r, wg * msel, preferred_element_type=f32)     # (L, H)

    # --- w_concat + (identity) dropout + residual linear + LayerNorm + linear1
    z = jnp.dot(cat, wcat_ref[...], preferred_element_type=f32) + bcat_ref[...] + xl
    mean = jnp.mean(z, axis=-1, keepdims=True)
    zc = z - mean
    var = jnp.mean(zc * zc, axis=-1, keepdims=True)                 # unbiased=False
    zn = zc * jax.lax.rsqrt(var + eps)                              # gamma/beta folded into w_out/b_out
    o_ref[...] = jnp.dot(zn, w_out_ref[...], preferred_element_type=f32) + b_out_ref[...]


# ------------------------- one-time parameter packing ---------------------- #

def pack_params(params):
    """Offline packing / algebraic folding of the module parameters.

    * wq|wk|wv|wl -> one (in_feats, 4*h_feats) weight + one packed bias.
    * LayerNorm affine folded into linear1: w_out = diag(gamma) @ w1,
      b_out = beta @ w1 + b1 (valid since the affine directly feeds the linear).
    Done once, outside the per-call jit, so the kernel sees 7 inputs instead of 21.
    """
    w_all = jnp.concatenate(
        [params['wq'], params['wk'], params['wv'], params['wl']], axis=1)
    b_all = jnp.concatenate(
        [params['bq'], params['bk'], params['bv'], params['bl']], axis=1)
    w_out = params['gamma'].reshape(-1, 1) * params['w1']
    b_out = params['beta'] @ params['w1'] + params['b1']
    return dict(w_all=w_all, b_all=b_all, wcat=params['wcat'],
                bcat=params['bcat'], w_out=w_out, b_out=b_out)


# ------------------------------ host wrapper ------------------------------- #

@functools.partial(jax.jit, static_argnames=("n_head", "eps"))
def decoder_layer_forward(x, edge_index, packed, n_head, eps=1e-12):
    del edge_index  # unused by the reference forward
    L, in_feats = x.shape
    W4 = packed['w_all'].shape[1]
    H = W4 // 4

    kernel = functools.partial(_decoder_kernel, n_head=n_head,
                               inv_scale=1.0 / math.sqrt(n_head), eps=eps)

    in_specs = [
        _vmem_full((L, in_feats)),       # x
        _vmem_full((in_feats, W4)),      # packed [wq|wk|wv|wl]
        _vmem_full((1, W4)),             # packed [bq|bk|bv|bl]
        _vmem_full((H, H)),              # w_concat
        _vmem_full((1, H)),              # b_concat
        _vmem_full((H, in_feats)),       # gamma-folded linear1 weight
        _vmem_full((1, in_feats)),       # beta/b1-folded linear1 bias
    ]

    # Single grid step: the whole layer is VMEM-resident; at these shapes the
    # call is dispatch/prologue bound, so more pipelining depth is pure overhead.
    # TODO(synk): amortize dispatch for production by batching sequences with a
    # ("parallel",) grid over batch and a lane-dense (>=128-wide) output slab.
    return pl.pallas_call(
        kernel,
        out_shape=jax.ShapeDtypeStruct((L, in_feats), jnp.float32),
        in_specs=in_specs,
        out_specs=_vmem_full((L, in_feats)),
    )(x, packed['w_all'], packed['b_all'], packed['wcat'], packed['bcat'],
      packed['w_out'], packed['b_out'])


# ----------------------- deterministic parameter init ---------------------- #

def init_params(key, in_feats, h_feats):
    ks = jax.random.split(key, 12)

    def lin(kw, kb, fin, fout):
        bound = 1.0 / math.sqrt(fin)           # PyTorch nn.Linear default init
        w = jax.random.uniform(kw, (fin, fout), jnp.float32, -bound, bound)
        b = jax.random.uniform(kb, (1, fout), jnp.float32, -bound, bound)
        return w, b

    wq, bq = lin(ks[0], ks[1], in_feats, h_feats)
    wk, bk = lin(ks[2], ks[3], in_feats, h_feats)
    wv, bv = lin(ks[4], ks[5], in_feats, h_feats)
    wcat, bcat = lin(ks[6], ks[7], h_feats, h_feats)
    wl, bl = lin(ks[8], ks[9], in_feats, h_feats)        # DecoderLayer.linear
    w1, b1 = lin(ks[10], ks[11], h_feats, in_feats)      # DecoderLayer.linear1
    return dict(wq=wq, bq=bq, wk=wk, bk=bk, wv=wv, bv=bv,
                wcat=wcat, bcat=bcat, wl=wl, bl=bl, w1=w1, b1=b1,
                gamma=jnp.ones((1, h_feats), jnp.float32),
                beta=jnp.zeros((1, h_feats), jnp.float32))


# ------------------------- pure-JAX reference check ------------------------ #

def reference(x, params, n_head, eps=1e-12):
    L, _ = x.shape
    h_feats = params['wq'].shape[1]
    d_t = h_feats // n_head
    q = x @ params['wq'] + params['bq']
    k = x @ params['wk'] + params['bk']
    v = x @ params['wv'] + params['bv']
    split = lambda t: t.reshape(L, n_head, d_t).transpose(0, 2, 1)
    qs, ks, vs = split(q), split(k), split(v)
    s = jnp.einsum('lih,ljh->lij', qs, ks) / math.sqrt(n_head)
    p = jax.nn.softmax(s, axis=-1)
    o = jnp.einsum('lij,ljh->lih', p, vs)
    cat = o.transpose(0, 2, 1).reshape(L, h_feats)
    y = cat @ params['wcat'] + params['bcat']
    xl = x @ params['wl'] + params['bl']
    z = y + xl
    mean = z.mean(-1, keepdims=True)
    var = ((z - mean) ** 2).mean(-1, keepdims=True)
    zn = (z - mean) / jnp.sqrt(var + eps)
    zn = params['gamma'] * zn + params['beta']
    return zn @ params['w1'] + params['b1']


if __name__ == "__main__":
    key = jax.random.PRNGKey(0)
    kx, kp = jax.random.split(key)

    # small shapes consistent with the module: seq L=8, in_feats=32, h_feats=32, 4 heads
    L, in_feats, h_feats, n_head = 8, 32, 32, 4
    x = jax.random.normal(kx, (L, in_feats), jnp.float32)
    edge_index = jnp.zeros((2, 4), jnp.int32)   # unused by the forward pass
    params = init_params(kp, in_feats, h_feats)
    packed = pack_params(params)                # one-time offline packing/folding

    out = decoder_layer_forward(x, edge_index, packed, n_head=n_head)
    out = jax.block_until_ready(out)

    ref = reference(x, params, n_head)
    assert out.shape == (L, in_feats)
    err = float(jnp.max(jnp.abs(out - ref)))
    # 10x tighter than before; the approx (EUP) softmax reciprocal limits the
    # achievable match to ~1e-3 — with approx=False this path agrees to ~1e-4.
    assert jnp.allclose(out, ref, atol=5e-3, rtol=5e-3), err
    print("KERNEL_OK")
</pallas_src>

<mosaic_0001>
module attributes {stable_mosaic.version = 11 : i64} {
  func.func @_decoder_kernel(%arg0: memref<8x32xf32, #tpu.memory_space<vmem>>, %arg1: memref<32x128xf32, #tpu.memory_space<vmem>>, %arg2: memref<1x128xf32, #tpu.memory_space<vmem>>, %arg3: memref<32x32xf32, #tpu.memory_space<vmem>>, %arg4: memref<1x32xf32, #tpu.memory_space<vmem>>, %arg5: memref<32x32xf32, #tpu.memory_space<vmem>>, %arg6: memref<1x32xf32, #tpu.memory_space<vmem>>, %arg7: memref<8x32xf32, #tpu.memory_space<vmem>>) attributes {dimension_semantics = [], scalar_prefetch = 0 : i64, scratch_operands = 0 : i64, tpu.core_type = #tpu.core_type<tc>} {
    %c0 = arith.constant 0 : index
    %c0_0 = arith.constant 0 : index
    %0 = vector.load %arg0[%c0, %c0_0] : memref<8x32xf32, #tpu.memory_space<vmem>>, vector<8x32xf32>
    %1 = tpu.iota {dimensions = array<i32: 0>} : vector<64x8xi32>
    %2 = arith.sitofp %1 : vector<64x8xi32> to vector<64x8xf32>
    %3 = tpu.iota {dimensions = array<i32: 1>} : vector<64x8xi32>
    %4 = arith.sitofp %3 : vector<64x8xi32> to vector<64x8xf32>
    %cst = arith.constant 5.000000e-01 : f32
    %5 = vector.broadcast %cst : f32 to vector<64x8xf32>
    %6 = arith.addf %2, %5 : vector<64x8xf32>
    %cst_1 = arith.constant 1.250000e-01 : f32
    %7 = vector.broadcast %cst_1 : f32 to vector<64x8xf32>
    %8 = arith.mulf %6, %7 : vector<64x8xf32>
    %9 = math.floor %8 : vector<64x8xf32>
    %10 = arith.cmpf oeq, %9, %4 : vector<64x8xf32>
    %cst_2 = arith.constant 1.000000e+00 : f32
    %cst_3 = arith.constant 0.000000e+00 : f32
    %11 = vector.broadcast %cst_2 : f32 to vector<64x8xf32>
    %12 = vector.broadcast %cst_3 : f32 to vector<64x8xf32>
    %13 = arith.select %10, %11, %12 : vector<64x8xi1>, vector<64x8xf32>
    %14 = tpu.iota {dimensions = array<i32: 0>} : vector<8x64xi32>
    %15 = arith.sitofp %14 : vector<8x64xi32> to vector<8x64xf32>
    %16 = tpu.iota {dimensions = array<i32: 1>} : vector<8x64xi32>
    %17 = arith.sitofp %16 : vector<8x64xi32> to vector<8x64xf32>
    %cst_4 = arith.constant 5.000000e-01 : f32
    %18 = vector.broadcast %cst_4 : f32 to vector<8x64xf32>
    %19 = arith.addf %17, %18 : vector<8x64xf32>
    %cst_5 = arith.constant 1.250000e-01 : f32
    %20 = vector.broadcast %cst_5 : f32 to vector<8x64xf32>
    %21 = arith.mulf %19, %20 : vector<8x64xf32>
    %22 = math.floor %21 : vector<8x64xf32>
    %23 = arith.cmpf oeq, %22, %15 : vector<8x64xf32>
    %cst_6 = arith.constant 1.000000e+00 : f32
    %cst_7 = arith.constant 0.000000e+00 : f32
    %24 = vector.broadcast %cst_6 : f32 to vector<8x64xf32>
    %25 = vector.broadcast %cst_7 : f32 to vector<8x64xf32>
    %26 = arith.select %23, %24, %25 : vector<8x64xi1>, vector<8x64xf32>
    %27 = tpu.iota {dimensions = array<i32: 0>} : vector<64x128xi32>
    %28 = arith.sitofp %27 : vector<64x128xi32> to vector<64x128xf32>
    %29 = tpu.iota {dimensions = array<i32: 1>} : vector<64x128xi32>
    %30 = arith.sitofp %29 : vector<64x128xi32> to vector<64x128xf32>
    %cst_8 = arith.constant 5.000000e-01 : f32
    %31 = vector.broadcast %cst_8 : f32 to vector<64x128xf32>
    %32 = arith.addf %28, %31 : vector<64x128xf32>
    %cst_9 = arith.constant 1.250000e-01 : f32
    %33 = vector.broadcast %cst_9 : f32 to vector<64x128xf32>
    %34 = arith.mulf %32, %33 : vector<64x128xf32>
    %35 = math.floor %34 : vector<64x128xf32>
    %cst_10 = arith.constant 8.000000e+00 : f32
    %36 = vector.broadcast %cst_10 : f32 to vector<64x128xf32>
    %37 = arith.mulf %36, %35 : vector<64x128xf32>
    %38 = arith.subf %28, %37 : vector<64x128xf32>
    %cst_11 = arith.constant 5.000000e-01 : f32
    %39 = vector.broadcast %cst_11 : f32 to vector<64x128xf32>
    %40 = arith.addf %30, %39 : vector<64x128xf32>
    %cst_12 = arith.constant 1.250000e-01 : f32
    %41 = vector.broadcast %cst_12 : f32 to vector<64x128xf32>
    %42 = arith.mulf %40, %41 : vector<64x128xf32>
    %43 = math.floor %42 : vector<64x128xf32>
    %cst_13 = arith.constant 8.000000e+00 : f32
    %44 = vector.broadcast %cst_13 : f32 to vector<64x128xf32>
    %45 = arith.mulf %44, %43 : vector<64x128xf32>
    %46 = arith.subf %30, %45 : vector<64x128xf32>
    %47 = arith.cmpf oeq, %38, %46 : vector<64x128xf32>
    %cst_14 = arith.constant 1.000000e+00 : f32
    %cst_15 = arith.constant 0.000000e+00 : f32
    %48 = vector.broadcast %cst_14 : f32 to vector<64x128xf32>
    %49 = vector.broadcast %cst_15 : f32 to vector<64x128xf32>
    %50 = arith.select %47, %48, %49 : vector<64x128xi1>, vector<64x128xf32>
    %51 = tpu.iota {dimensions = array<i32: 0>} : vector<64x32xi32>
    %52 = arith.sitofp %51 : vector<64x32xi32> to vector<64x32xf32>
    %53 = tpu.iota {dimensions = array<i32: 1>} : vector<64x32xi32>
    %54 = arith.sitofp %53 : vector<64x32xi32> to vector<64x32xf32>
    %cst_16 = arith.constant 5.000000e-01 : f32
    %55 = vector.broadcast %cst_16 : f32 to vector<64x32xf32>
    %56 = arith.addf %52, %55 : vector<64x32xf32>
    %cst_17 = arith.constant 1.250000e-01 : f32
    %57 = vector.broadcast %cst_17 : f32 to vector<64x32xf32>
    %58 = arith.mulf %56, %57 : vector<64x32xf32>
    %59 = math.floor %58 : vector<64x32xf32>
    %cst_18 = arith.constant 8.000000e+00 : f32
    %60 = vector.broadcast %cst_18 : f32 to vector<64x32xf32>
    %61 = arith.mulf %60, %59 : vector<64x32xf32>
    %62 = arith.subf %52, %61 : vector<64x32xf32>
    %cst_19 = arith.constant 5.000000e-01 : f32
    %63 = vector.broadcast %cst_19 : f32 to vector<64x32xf32>
    %64 = arith.addf %54, %63 : vector<64x32xf32>
    %cst_20 = arith.constant 1.250000e-01 : f32
    %65 = vector.broadcast %cst_20 : f32 to vector<64x32xf32>
    %66 = arith.mulf %64, %65 : vector<64x32xf32>
    %67 = math.floor %66 : vector<64x32xf32>
    %cst_21 = arith.constant 8.000000e+00 : f32
    %68 = vector.broadcast %cst_21 : f32 to vector<64x32xf32>
    %69 = arith.mulf %68, %67 : vector<64x32xf32>
    %70 = arith.subf %54, %69 : vector<64x32xf32>
    %71 = arith.cmpf oeq, %62, %70 : vector<64x32xf32>
    %cst_22 = arith.constant 1.000000e+00 : f32
    %cst_23 = arith.constant 0.000000e+00 : f32
    %72 = vector.broadcast %cst_22 : f32 to vector<64x32xf32>
    %73 = vector.broadcast %cst_23 : f32 to vector<64x32xf32>
    %74 = arith.select %71, %72, %73 : vector<64x32xi1>, vector<64x32xf32>
    %75 = tpu.iota {dimensions = array<i32: 0>} : vector<128x128xi32>
    %76 = arith.sitofp %75 : vector<128x128xi32> to vector<128x128xf32>
    %77 = tpu.iota {dimensions = array<i32: 1>} : vector<128x128xi32>
    %78 = arith.sitofp %77 : vector<128x128xi32> to vector<128x128xf32>
    %cst_24 = arith.constant 3.200000e+01 : f32
    %79 = vector.broadcast %cst_24 : f32 to vector<128x128xf32>
    %80 = arith.cmpf olt, %76, %79 : vector<128x128xf32>
    %cst_25 = arith.constant 3.200000e+01 : f32
    %81 = vector.broadcast %cst_25 : f32 to vector<128x128xf32>
    %82 = arith.cmpf oge, %78, %81 : vector<128x128xf32>
    %83 = arith.andi %80, %82 : vector<128x128xi1>
    %cst_26 = arith.constant 6.400000e+01 : f32
    %84 = vector.broadcast %cst_26 : f32 to vector<128x128xf32>
    %85 = arith.cmpf olt, %78, %84 : vector<128x128xf32>
    %86 = arith.andi %83, %85 : vector<128x128xi1>
    %cst_27 = arith.constant 5.000000e-01 : f32
    %87 = vector.broadcast %cst_27 : f32 to vector<128x128xf32>
    %88 = arith.addf %76, %87 : vector<128x128xf32>
    %cst_28 = arith.constant 1.250000e-01 : f32
    %89 = vector.broadcast %cst_28 : f32 to vector<128x128xf32>
    %90 = arith.mulf %88, %89 : vector<128x128xf32>
    %91 = math.floor %90 : vector<128x128xf32>
    %cst_29 = arith.constant 3.200000e+01 : f32
    %92 = vector.broadcast %cst_29 : f32 to vector<128x128xf32>
    %93 = arith.subf %78, %92 : vector<128x128xf32>
    %cst_30 = arith.constant 5.000000e-01 : f32
    %94 = vector.broadcast %cst_30 : f32 to vector<128x128xf32>
    %95 = arith.addf %93, %94 : vector<128x128xf32>
    %cst_31 = arith.constant 1.250000e-01 : f32
    %96 = vector.broadcast %cst_31 : f32 to vector<128x128xf32>
    %97 = arith.mulf %95, %96 : vector<128x128xf32>
    %98 = math.floor %97 : vector<128x128xf32>
    %99 = arith.cmpf oeq, %91, %98 : vector<128x128xf32>
    %100 = arith.andi %86, %99 : vector<128x128xi1>
    %cst_32 = arith.constant 1.000000e+00 : f32
    %cst_33 = arith.constant 0.000000e+00 : f32
    %101 = vector.broadcast %cst_32 : f32 to vector<128x128xf32>
    %102 = vector.broadcast %cst_33 : f32 to vector<128x128xf32>
    %103 = arith.select %100, %101, %102 : vector<128x128xi1>, vector<128x128xf32>
    %104 = tpu.iota {dimensions = array<i32: 0>} : vector<128x8xi32>
    %105 = arith.sitofp %104 : vector<128x8xi32> to vector<128x8xf32>
    %106 = tpu.iota {dimensions = array<i32: 1>} : vector<128x8xi32>
    %107 = arith.sitofp %106 : vector<128x8xi32> to vector<128x8xf32>
    %cst_34 = arith.constant 5.000000e-01 : f32
    %108 = vector.broadcast %cst_34 : f32 to vector<128x8xf32>
    %109 = arith.addf %105, %108 : vector<128x8xf32>
    %cst_35 = arith.constant 1.250000e-01 : f32
    %110 = vector.broadcast %cst_35 : f32 to vector<128x8xf32>
    %111 = arith.mulf %109, %110 : vector<128x8xf32>
    %112 = math.floor %111 : vector<128x8xf32>
    %cst_36 = arith.constant 8.000000e+00 : f32
    %113 = vector.broadcast %cst_36 : f32 to vector<128x8xf32>
    %114 = arith.mulf %113, %112 : vector<128x8xf32>
    %115 = arith.subf %105, %114 : vector<128x8xf32>
    %116 = arith.cmpf oeq, %115, %107 : vector<128x8xf32>
    %cst_37 = arith.constant 5.000000e-01 : f32
    %cst_38 = arith.constant 0.000000e+00 : f32
    %117 = vector.broadcast %cst_37 : f32 to vector<128x8xf32>
    %118 = vector.broadcast %cst_38 : f32 to vector<128x8xf32>
    %119 = arith.select %116, %117, %118 : vector<128x8xi1>, vector<128x8xf32>
    %120 = tpu.iota {dimensions = array<i32: 0>} : vector<8x128xi32>
    %121 = arith.sitofp %120 : vector<8x128xi32> to vector<8x128xf32>
    %122 = tpu.iota {dimensions = array<i32: 1>} : vector<8x128xi32>
    %123 = arith.sitofp %122 : vector<8x128xi32> to vector<8x128xf32>
    %cst_39 = arith.constant 5.000000e-01 : f32
    %124 = vector.broadcast %cst_39 : f32 to vector<8x128xf32>
    %125 = arith.addf %123, %124 : vector<8x128xf32>
    %cst_40 = arith.constant 1.250000e-01 : f32
    %126 = vector.broadcast %cst_40 : f32 to vector<8x128xf32>
    %127 = arith.mulf %125, %126 : vector<8x128xf32>
    %128 = math.floor %127 : vector<8x128xf32>
    %cst_41 = arith.constant 8.000000e+00 : f32
    %129 = vector.broadcast %cst_41 : f32 to vector<8x128xf32>
    %130 = arith.mulf %129, %128 : vector<8x128xf32>
    %131 = arith.subf %123, %130 : vector<8x128xf32>
    %132 = arith.cmpf oeq, %131, %121 : vector<8x128xf32>
    %cst_42 = arith.constant 1.000000e+00 : f32
    %cst_43 = arith.constant 0.000000e+00 : f32
    %133 = vector.broadcast %cst_42 : f32 to vector<8x128xf32>
    %134 = vector.broadcast %cst_43 : f32 to vector<8x128xf32>
    %135 = arith.select %132, %133, %134 : vector<8x128xi1>, vector<8x128xf32>
    %136 = tpu.iota {dimensions = array<i32: 0>} : vector<128x32xi32>
    %137 = arith.sitofp %136 : vector<128x32xi32> to vector<128x32xf32>
    %138 = tpu.iota {dimensions = array<i32: 1>} : vector<128x32xi32>
    %139 = arith.sitofp %138 : vector<128x32xi32> to vector<128x32xf32>
    %cst_44 = arith.constant 6.400000e+01 : f32
    %140 = vector.broadcast %cst_44 : f32 to vector<128x32xf32>
    %141 = arith.cmpf oge, %137, %140 : vector<128x32xf32>
    %cst_45 = arith.constant 9.600000e+01 : f32
    %142 = vector.broadcast %cst_45 : f32 to vector<128x32xf32>
    %143 = arith.cmpf olt, %137, %142 : vector<128x32xf32>
    %144 = arith.andi %141, %143 : vector<128x32xi1>
    %cst_46 = arith.constant 6.400000e+01 : f32
    %145 = vector.broadcast %cst_46 : f32 to vector<128x32xf32>
    %146 = arith.subf %137, %145 : vector<128x32xf32>
    %cst_47 = arith.constant 5.000000e-01 : f32
    %147 = vector.broadcast %cst_47 : f32 to vector<128x32xf32>
    %148 = arith.addf %146, %147 : vector<128x32xf32>
    %cst_48 = arith.constant 1.250000e-01 : f32
    %149 = vector.broadcast %cst_48 : f32 to vector<128x32xf32>
    %150 = arith.mulf %148, %149 : vector<128x32xf32>
    %151 = math.floor %150 : vector<128x32xf32>
    %cst_49 = arith.constant 5.000000e-01 : f32
    %152 = vector.broadcast %cst_49 : f32 to vector<128x32xf32>
    %153 = arith.addf %139, %152 : vector<128x32xf32>
    %cst_50 = arith.constant 1.250000e-01 : f32
    %154 = vector.broadcast %cst_50 : f32 to vector<128x32xf32>
    %155 = arith.mulf %153, %154 : vector<128x32xf32>
    %156 = math.floor %155 : vector<128x32xf32>
    %157 = arith.cmpf oeq, %151, %156 : vector<128x32xf32>
    %158 = arith.andi %144, %157 : vector<128x32xi1>
    %cst_51 = arith.constant 1.000000e+00 : f32
    %cst_52 = arith.constant 0.000000e+00 : f32
    %159 = vector.broadcast %cst_51 : f32 to vector<128x32xf32>
    %160 = vector.broadcast %cst_52 : f32 to vector<128x32xf32>
    %161 = arith.select %158, %159, %160 : vector<128x32xi1>, vector<128x32xf32>
    %cst_53 = arith.constant 9.600000e+01 : f32
    %162 = vector.broadcast %cst_53 : f32 to vector<128x32xf32>
    %163 = arith.subf %137, %162 : vector<128x32xf32>
    %164 = arith.cmpf oeq, %163, %139 : vector<128x32xf32>
    %cst_54 = arith.constant 1.000000e+00 : f32
    %cst_55 = arith.constant 0.000000e+00 : f32
    %165 = vector.broadcast %cst_54 : f32 to vector<128x32xf32>
    %166 = vector.broadcast %cst_55 : f32 to vector<128x32xf32>
    %167 = arith.select %164, %165, %166 : vector<128x32xi1>, vector<128x32xf32>
    %c0_56 = arith.constant 0 : index
    %c0_57 = arith.constant 0 : index
    %168 = vector.load %arg1[%c0_56, %c0_57] : memref<32x128xf32, #tpu.memory_space<vmem>>, vector<32x128xf32>
    %cst_58 = arith.constant dense<0.000000e+00> : vector<8x128xf32>
    %169 = tpu.matmul %0, %168, %cst_58 {dimension_numbers = #tpu.dot_dimension_numbers<[1], [0], [0], [1], [0, 0, 1, 1], [], []>} : vector<8x32xf32>, vector<32x128xf32>, vector<8x128xf32> -> vector<8x128xf32>
    %c0_59 = arith.constant 0 : index
    %c0_60 = arith.constant 0 : index
    %170 = vector.load %arg2[%c0_59, %c0_60] : memref<1x128xf32, #tpu.memory_space<vmem>>, vector<1x128xf32>
    %171 = vector.broadcast %170 : vector<1x128xf32> to vector<8x128xf32>
    %172 = arith.addf %169, %171 : vector<8x128xf32>
    %cst_61 = arith.constant dense<0.000000e+00> : vector<8x32xf32>
    %173 = tpu.matmul %172, %167, %cst_61 {dimension_numbers = #tpu.dot_dimension_numbers<[1], [0], [0], [1], [0, 0, 1, 1], [], []>} : vector<8x128xf32>, vector<128x32xf32>, vector<8x32xf32> -> vector<8x32xf32>
    %cst_62 = arith.constant dense<0.000000e+00> : vector<64x128xf32>
    %174 = tpu.matmul %13, %172, %cst_62 {dimension_numbers = #tpu.dot_dimension_numbers<[1], [0], [0], [1], [0, 0, 1, 1], [], []>} : vector<64x8xf32>, vector<8x128xf32>, vector<64x128xf32> -> vector<64x128xf32>
    %175 = arith.mulf %174, %50 : vector<64x128xf32>
    %cst_63 = arith.constant dense<0.000000e+00> : vector<64x128xf32>
    %176 = tpu.matmul %175, %103, %cst_63 {dimension_numbers = #tpu.dot_dimension_numbers<[1], [0], [0], [1], [0, 0, 1, 1], [], []>} : vector<64x128xf32>, vector<128x128xf32>, vector<64x128xf32> -> vector<64x128xf32>
    %177 = arith.mulf %176, %174 : vector<64x128xf32>
    %cst_64 = arith.constant dense<0.000000e+00> : vector<64x8xf32>
    %178 = tpu.matmul %177, %119, %cst_64 {dimension_numbers = #tpu.dot_dimension_numbers<[1], [0], [0], [1], [0, 0, 1, 1], [], []>} : vector<64x128xf32>, vector<128x8xf32>, vector<64x8xf32> -> vector<64x8xf32>
    %cst_65 = arith.constant dense<0xFF800000> : vector<64xf32>
    %179 = vector.multi_reduction <maximumf>, %178, %cst_65 [1] : vector<64x8xf32> to vector<64xf32>
    %180 = vector.shape_cast %179 : vector<64xf32> to vector<64x1xf32>
    %181 = vector.broadcast %180 : vector<64x1xf32> to vector<64x8xf32>
    %182 = arith.subf %178, %181 : vector<64x8xf32>
    %183 = math.exp %182 : vector<64x8xf32>
    %cst_66 = arith.constant dense<0.000000e+00> : vector<64xf32>
    %184 = vector.multi_reduction <add>, %183, %cst_66 [1] : vector<64x8xf32> to vector<64xf32>
    %185 = vector.shape_cast %184 : vector<64xf32> to vector<64x1xf32>
    %186 = tpu.reciprocal %185 {approx = true} : vector<64x1xf32> -> vector<64x1xf32>
    %187 = vector.broadcast %186 : vector<64x1xf32> to vector<64x8xf32>
    %188 = arith.mulf %183, %187 : vector<64x8xf32>
    %cst_67 = arith.constant dense<0.000000e+00> : vector<64x128xf32>
    %189 = tpu.matmul %188, %135, %cst_67 {dimension_numbers = #tpu.dot_dimension_numbers<[1], [0], [0], [1], [0, 0, 1, 1], [], []>} : vector<64x8xf32>, vector<8x128xf32>, vector<64x128xf32> -> vector<64x128xf32>
    %190 = arith.mulf %189, %174 : vector<64x128xf32>
    %cst_68 = arith.constant dense<0.000000e+00> : vector<64x32xf32>
    %191 = tpu.matmul %190, %161, %cst_68 {dimension_numbers = #tpu.dot_dimension_numbers<[1], [0], [0], [1], [0, 0, 1, 1], [], []>} : vector<64x128xf32>, vector<128x32xf32>, vector<64x32xf32> -> vector<64x32xf32>
    %192 = arith.mulf %191, %74 : vector<64x32xf32>
    %cst_69 = arith.constant dense<0.000000e+00> : vector<8x32xf32>
    %193 = tpu.matmul %26, %192, %cst_69 {dimension_numbers = #tpu.dot_dimension_numbers<[1], [0], [0], [1], [0, 0, 1, 1], [], []>} : vector<8x64xf32>, vector<64x32xf32>, vector<8x32xf32> -> vector<8x32xf32>
    %c0_70 = arith.constant 0 : index
    %c0_71 = arith.constant 0 : index
    %194 = vector.load %arg3[%c0_70, %c0_71] : memref<32x32xf32, #tpu.memory_space<vmem>>, vector<32x32xf32>
    %cst_72 = arith.constant dense<0.000000e+00> : vector<8x32xf32>
    %195 = tpu.matmul %193, %194, %cst_72 {dimension_numbers = #tpu.dot_dimension_numbers<[1], [0], [0], [1], [0, 0, 1, 1], [], []>} : vector<8x32xf32>, vector<32x32xf32>, vector<8x32xf32> -> vector<8x32xf32>
    %c0_73 = arith.constant 0 : index
    %c0_74 = arith.constant 0 : index
    %196 = vector.load %arg4[%c0_73, %c0_74] : memref<1x32xf32, #tpu.memory_space<vmem>>, vector<1x32xf32>
    %197 = vector.broadcast %196 : vector<1x32xf32> to vector<8x32xf32>
    %198 = arith.addf %195, %197 : vector<8x32xf32>
    %199 = arith.addf %198, %173 : vector<8x32xf32>
    %cst_75 = arith.constant dense<0.000000e+00> : vector<8xf32>
    %200 = vector.multi_reduction <add>, %199, %cst_75 [1] : vector<8x32xf32> to vector<8xf32>
    %201 = vector.shape_cast %200 : vector<8xf32> to vector<8x1xf32>
    %cst_76 = arith.constant 3.200000e+01 : f32
    %202 = vector.broadcast %cst_76 : f32 to vector<8x1xf32>
    %203 = arith.divf %201, %202 : vector<8x1xf32>
    %204 = vector.broadcast %203 : vector<8x1xf32> to vector<8x32xf32>
    %205 = arith.subf %199, %204 : vector<8x32xf32>
    %206 = arith.mulf %205, %205 : vector<8x32xf32>
    %cst_77 = arith.constant dense<0.000000e+00> : vector<8xf32>
    %207 = vector.multi_reduction <add>, %206, %cst_77 [1] : vector<8x32xf32> to vector<8xf32>
    %208 = vector.shape_cast %207 : vector<8xf32> to vector<8x1xf32>
    %cst_78 = arith.constant 3.200000e+01 : f32
    %209 = vector.broadcast %cst_78 : f32 to vector<8x1xf32>
    %210 = arith.divf %208, %209 : vector<8x1xf32>
    %cst_79 = arith.constant 9.99999996E-13 : f32
    %211 = vector.broadcast %cst_79 : f32 to vector<8x1xf32>
    %212 = arith.addf %210, %211 : vector<8x1xf32>
    %213 = math.rsqrt %212 : vector<8x1xf32>
    %214 = vector.broadcast %213 : vector<8x1xf32> to vector<8x32xf32>
    %215 = arith.mulf %205, %214 : vector<8x32xf32>
    %c0_80 = arith.constant 0 : index
    %c0_81 = arith.constant 0 : index
    %216 = vector.load %arg5[%c0_80, %c0_81] : memref<32x32xf32, #tpu.memory_space<vmem>>, vector<32x32xf32>
    %cst_82 = arith.constant dense<0.000000e+00> : vector<8x32xf32>
    %217 = tpu.matmul %215, %216, %cst_82 {dimension_numbers = #tpu.dot_dimension_numbers<[1], [0], [0], [1], [0, 0, 1, 1], [], []>} : vector<8x32xf32>, vector<32x32xf32>, vector<8x32xf32> -> vector<8x32xf32>
    %c0_83 = arith.constant 0 : index
    %c0_84 = arith.constant 0 : index
    %218 = vector.load %arg6[%c0_83, %c0_84] : memref<1x32xf32, #tpu.memory_space<vmem>>, vector<1x32xf32>
    %219 = vector.broadcast %218 : vector<1x32xf32> to vector<8x32xf32>
    %220 = arith.addf %217, %219 : vector<8x32xf32>
    %c0_85 = arith.constant 0 : index
    %c0_86 = arith.constant 0 : index
    %221 = vector.load %arg7[%c0_85, %c0_86] : memref<8x32xf32, #tpu.memory_space<vmem>>, vector<8x32xf32>
    tpu.vector_store %arg7[%c0_85, %c0_86], %220 {strides = array<i32>} : memref<8x32xf32, #tpu.memory_space<vmem>>, vector<8x32xf32>,
    return
  }
}

</mosaic_0001>

<bundles_post_ra>
// kernel: decoder_layer_forward.1
= control target key start
LH: loop header
LB: loop body
LE: loop exit
PB: predicated region body
PF: predicated region fallthrough
CT: control target
= control target key end

     0   :  { %12 = vsyncpa [#allocation3], 0  ;;  %s3633_s0 = inlined_call_operand.hbm [shape: f32[8,32], index: 0, kind: input, shape index: {}]   ;;  %s3634_s1 = inlined_call_operand.hbm [shape: f32[32,128], index: 1, kind: input, shape index: {}]   ;;  %s3635_s2 = inlined_call_operand.vmem [shape: f32[1,128], index: 2, kind: input, shape index: {}]   ;;  %s3636_s3 = inlined_call_operand.hbm [shape: f32[32,32], index: 3, kind: input, shape index: {}]   ;;  %s3637_s4 = inlined_call_operand.vmem [shape: f32[1,32], index: 4, kind: input, shape index: {}]   ;;  %s3638_s5 = inlined_call_operand.hbm [shape: f32[32,32], index: 5, kind: input, shape index: {}]   ;;  %s3639_s6 = inlined_call_operand.vmem [shape: f32[1,32], index: 6, kind: input, shape index: {}]   ;;  %s3640_s7 = inlined_call_operand.hbm [shape: f32[8,32], index: 7, kind: output, shape index: {}]  }
   0x1   :  { %13 = vsyncpa [#allocation6], 0 }
   0x2   :  { %14 = vsyncpa [#allocation9], 0 }
   0x3   :  { %15 = vsyncpa [#allocation4], 0  ;;  %s2521_s24 = smov [#allocation5]   ;;  %s2403_s28 = scalar_lea.hbm %s3634_s1, 512 }
   0x4   :  { %s31_s25 = sshll.u32 %s2521_s24, 4  ;;  %p2404_p0 = scmp.ne.s32.totalorder %s3634_s1, %s2403_s28  ;;  %s32_s25 = int_to_ptr.vmem [resolvable:$true] %s31_s25 }
   0x5   :  { %p2407_p1 = scmp.lt.u32.totalorder %s2403_s28, %s3634_s1 }
   0x7   :  { %p2409_p2 = pnand %p2407_p1, %p2404_p0 }
   0x9   :  { %2412 = shalt.err (!%p2409_p2)
}
   0xa   :  { %s2413_s10 = scalar_lea.vmem %s32_s25, 512  ;;  %p2418_p4 = scmp.lt.s32.totalorder %s32_s25, %s32_s25 }
   0xb   :  { %p2414_p3 = scmp.ne.s32.totalorder %s32_s25, %s2413_s10  ;;  %p2419_p5 = scmp.lt.s32.totalorder %s2413_s10, %s2413_s10 }
   0xd   :  { %p2420_p6 = por %p2419_p5, %p2418_p4 }
   0xf   :  { %p2421_p7 = pnand %p2420_p6, %p2414_p3 }
  0x11   :  { %2424 = shalt.err (!%p2421_p7)
}
  0x12   :  { %s2522_s11 = smov 128   ;;  %s2523_s12 = smov 8  }
  0x13   :  { %37 = dma.hbm_to_vmem [thread:$0]  %s3634_s1, 512, %s32_s25, [#allocation6], %s2522_s11, %s2522_s11, %s2523_s12  }
  0x14   :  { %s2524_s15 = smov [#allocation2]   ;;  %s2525_s17 = smov [#allocation7]  }
  0x15   :  { %s22_s16 = sshll.u32 %s2524_s15, 4  ;;  %s45_s18 = sshll.u32 %s2525_s17, 4  ;;  %s23_s16 = int_to_ptr.vmem [resolvable:$true] %s22_s16  ;;  %s46_s18 = int_to_ptr.vmem [resolvable:$true] %s45_s18 }
  0x16   :  { %s2425_s21 = scalar_lea.hbm %s3633_s0, 128 }
  0x17   :  { %p2426_p8 = scmp.ne.s32.totalorder %s3633_s0, %s2425_s21  ;;  %p2429_p9 = scmp.lt.u32.totalorder %s2425_s21, %s3633_s0 }
  0x19   :  { %p2431_p10 = pnand %p2429_p9, %p2426_p8 }
  0x1b   :  { %2434 = shalt.err (!%p2431_p10)
}
  0x1c   :  { %s2435_s1 = scalar_lea.vmem %s23_s16, 128  ;;  %p2440_p12 = scmp.lt.s32.totalorder %s23_s16, %s23_s16 }
  0x1d   :  { %p2436_p11 = scmp.ne.s32.totalorder %s23_s16, %s2435_s1  ;;  %p2441_p13 = scmp.lt.s32.totalorder %s2435_s1, %s2435_s1 }
  0x1f   :  { %p2442_p0 = por %p2441_p13, %p2440_p12 }
  0x21   :  { %p2443_p1 = pnand %p2442_p0, %p2436_p11 }
  0x23   :  { %2446 = shalt.err (!%p2443_p1)
}
  0x24   :  { %25 = dma.hbm_to_vmem [thread:$0]  %s3633_s0, 128, %s23_s16, [#allocation3]  }
  0x25   :  { %s2447_s30 = scalar_lea.hbm %s3636_s3, 512 }
  0x26   :  { %p2448_p2 = scmp.ne.s32.totalorder %s3636_s3, %s2447_s30  ;;  %p2451_p3 = scmp.lt.u32.totalorder %s2447_s30, %s3636_s3 }
  0x28   :  { %p2453_p4 = pnand %p2451_p3, %p2448_p2 }
  0x2a   :  { %2456 = shalt.err (!%p2453_p4)
}
  0x2b   :  { %s2457_s14 = scalar_lea.vmem %s46_s18, 512  ;;  %p2462_p6 = scmp.lt.s32.totalorder %s46_s18, %s46_s18 }
  0x2c   :  { %p2458_p5 = scmp.ne.s32.totalorder %s46_s18, %s2457_s14  ;;  %p2463_p7 = scmp.lt.s32.totalorder %s2457_s14, %s2457_s14 }
  0x2e   :  { %p2464_p8 = por %p2463_p7, %p2462_p6 }
  0x30   :  { %p2465_p9 = pnand %p2464_p8, %p2458_p5 }
  0x32   :  { %2468 = shalt.err (!%p2465_p9)
}
  0x33   :  { %51 = dma.hbm_to_vmem [thread:$0]  %s3636_s3, 512, %s46_s18, [#allocation6], %s2522_s11, %s2522_s11, %s2523_s12  }
  0x34   :  { %s2526_s16 = smov [#allocation8]   ;;  %s2469_s21 = scalar_lea.hbm %s3638_s5, 512 }
  0x35   :  { %s59_s17 = sshll.u32 %s2526_s16, 4  ;;  %p2470_p10 = scmp.ne.s32.totalorder %s3638_s5, %s2469_s21  ;;  %s60_s17 = int_to_ptr.vmem [resolvable:$true] %s59_s17 }
  0x36   :  { %p2473_p11 = scmp.lt.u32.totalorder %s2469_s21, %s3638_s5 }
  0x38   :  { %p2475_p12 = pnand %p2473_p11, %p2470_p10 }
  0x3a   :  { %2478 = shalt.err (!%p2475_p12)
}
  0x3b   :  { %s2479_s1 = scalar_lea.vmem %s60_s17, 512  ;;  %p2484_p0 = scmp.lt.s32.totalorder %s60_s17, %s60_s17 }
  0x3c   :  { %p2480_p13 = scmp.ne.s32.totalorder %s60_s17, %s2479_s1  ;;  %p2485_p1 = scmp.lt.s32.totalorder %s2479_s1, %s2479_s1 }
  0x3e   :  { %p2486_p2 = por %p2485_p1, %p2484_p0 }
  0x40   :  { %p2487_p3 = pnand %p2486_p2, %p2480_p13 }
  0x42   :  { %2490 = shalt.err (!%p2487_p3)
}
  0x43   :  { %65 = dma.hbm_to_vmem [thread:$0]  %s3638_s5, 512, %s60_s17, [#allocation9], %s2522_s11, %s2522_s11, %s2523_s12  }
  0x44   :  { %2513 = dma.done.wait [#allocation3], 128  }
  0x45   :  { %2514 = vsyncadd [#allocation3], 4294967168 }
  0x46   :  { %2515 = dma.done.wait [#allocation6], 1024  }
  0x47   :  { %2516 = vsyncadd [#allocation6], 4294966272 }
  0x48   :  { %2517 = dma.done.wait [#allocation9], 512  }
  0x49   :  { %2518 = vsyncadd [#allocation9], 4294966784  ;;  %v2527_v0 = vmov 0.0|0.0   ;;  %vm3642_vm0 = vmmov 0   ;;  %v2529_v1 = vmov 0.0   ;;  %v81_v2 = vlaneseq  ;;  %v580_v13 = vld [vmem:[#allocation5] sm:$0xff] }
  0x4a   :  { %2203 = vmatprep.subr.bf16.mxu0 %v2527_v0  ;;  %1964 = vmatprep.mubr.msk.f32.mxu0 %vm3642_vm0, %v2529_v1  ;;  %v581_v14 = vld [vmem:[#allocation5 + $0x8] sm:$0xff]  ;;  %v582_v15 = vld [vmem:[#allocation5 + $0x10] sm:$0xff]  ;;  %v583_v21 = vld [vmem:[#allocation5 + $0x18] sm:$0xff]  ;;  %vm3641_vm6 = vcmask 261120   ;;  %v2530_v34 = vmov 1.0|1.0  }
  0x4b   :  { %2209 = vmatprep.subr.bf16.mxu1 %v2527_v0  ;;  %1999 = vmatprep.mubr.msk.f32.mxu1 %vm3642_vm0, %v2529_v1  ;;  %v2637_v3 = vshrl.u32 %v81_v2, 7  ;;  %v99_v4 = vand.u32 127, %v81_v2  ;;  %v2204_v20 = vpack.c.bf16 %v581_v14, %v580_v13  ;;  %v2207_v25 = vpack.c.bf16 %v583_v21, %v582_v15  ;;  %v80_v36 = vld [vmem:[#allocation2] sm:$0xff]  ;;  %s2533_s27 = smov [#allocation10]  }
  0x4c   :  { %s1693_s28 = sshll.u32 %s2533_s27, 4  ;;  %s1694_s28 = int_to_ptr.vmem [resolvable:$true] %s1693_s28 }
  0x4d   :  { %v83_v5 = vadd.s32 8, %v2637_v3  ;;  %v2641_v6 = vcvt.s32.f32 %v2637_v3  ;;  %v2643_v7 = vcvt.s32.f32 %v99_v4  ;;  %v84_v8 = vadd.s32 16, %v2637_v3  ;;  %2205 = vmatpush3.bf16.msra.mxu0 %v2204_v20  ;;  %s2491_s29 = scalar_lea.vmem %s1694_s28, 128  ;;  %p2496_p5 = scmp.lt.s32.totalorder %s1694_s28, %s1694_s28 }
  0x4e   :  { %v85_v9 = vadd.s32 24, %v2637_v3  ;;  %v86_v10 = vadd.s32 32, %v2637_v3  ;;  %v87_v11 = vadd.s32 40, %v2637_v3  ;;  %v88_v12 = vadd.s32 48, %v2637_v3  ;;  %2206 = vmatprep.subr.bf16.mxu0 %v2527_v0  ;;  %p2492_p4 = scmp.ne.s32.totalorder %s1694_s28, %s2491_s29  ;;  %p2497_p6 = scmp.lt.s32.totalorder %s2491_s29, %s2491_s29 }
  0x4f   :  { %v2650_v16 = vcvt.s32.f32 %v83_v5  ;;  %v1721_v17 = vadd.f32 -96.0, %v2641_v6  ;;  %v2653_v18 = vcvt.s32.f32 %v84_v8  ;;  %v89_v19 = vadd.s32 56, %v2637_v3 }
  0x50   :  { %v2656_v22 = vcvt.s32.f32 %v85_v9  ;;  %v2658_v23 = vcvt.s32.f32 %v86_v10  ;;  %v2660_v24 = vcvt.s32.f32 %v87_v11  ;;  %v2668_v31 = vcvt.s32.f32 %v88_v12  ;;  %p2498_p7 = por %p2497_p6, %p2496_p5 }
  0x51   :  { %v1722_v26 = vadd.f32 -96.0, %v2650_v16  ;;  %vm548_vm1 = vcmp.eq.f32.partialorder %v1721_v17, %v2643_v7  ;;  %v1723_v27 = vadd.f32 -96.0, %v2653_v18  ;;  %v2673_v32 = vcvt.s32.f32 %v89_v19  ;;  %2208 = vmatpush3.bf16.msra.mxu0 %v2207_v25 }
  0x52   :  { %v1724_v28 = vadd.f32 -96.0, %v2656_v22  ;;  %v1725_v29 = vadd.f32 -96.0, %v2658_v23  ;;  %v1726_v30 = vadd.f32 -96.0, %v2660_v24  ;;  %v180_v33 = vadd.s32 64, %v2637_v3  ;;  %p2499_p8 = pnand %p2498_p7, %p2492_p4 }
  0x53   :  { %vm549_vm2 = vcmp.eq.f32.partialorder %v1722_v26, %v2643_v7  ;;  %vm550_vm3 = vcmp.eq.f32.partialorder %v1723_v27, %v2643_v7  ;;  %v181_v35 = vadd.s32 72, %v2637_v3  ;;  %v1727_v37 = vadd.f32 -96.0, %v2668_v31 }
  0x54   :  { %vm2210_vm4 = vmpackc.low %vm549_vm2, %vm548_vm1  ;;  %vm551_vm5 = vcmp.eq.f32.partialorder %v1724_v28, %v2643_v7  ;;  %vm552_vm8 = vcmp.eq.f32.partialorder %v1725_v29, %v2643_v7  ;;  %vm553_vm9 = vcmp.eq.f32.partialorder %v1726_v30, %v2643_v7  ;;  %v1728_v38 = vadd.f32 -96.0, %v2673_v32  ;;  %1965 = vmatmul.mubr.msk.f32.vlgmr.msra.gmra.mrb[0].mxu0 %vm3641_vm6, %v80_v36 }
  0x55   :  { %2211 = vmatpush3.bf16.msk.msra.mxu1 %vm2210_vm4, %v2530_v34  ;;  %vm2213_vm7 = vmpackc.low %vm551_vm5, %vm550_vm3  ;;  %v2684_v39 = vcvt.s32.f32 %v180_v33  ;;  %v2686_v40 = vcvt.s32.f32 %v181_v35  ;;  %v182_v41 = vadd.s32 80, %v2637_v3  ;;  %v183_v42 = vadd.s32 88, %v2637_v3 }
  0x56   :  { %2212 = vmatprep.subr.bf16.mxu1 %v2527_v0  ;;  %vm2216_vm10 = vmpackc.low %vm553_vm9, %vm552_vm8  ;;  %vm554_vm11 = vcmp.eq.f32.partialorder %v1727_v37, %v2643_v7  ;;  %vm555_vm12 = vcmp.eq.f32.partialorder %v1728_v38, %v2643_v7  ;;  %v184_v43 = vadd.s32 96, %v2637_v3  ;;  %v185_v44 = vadd.s32 104, %v2637_v3 }
  0x57   :  { %v1729_v45 = vadd.f32 -96.0, %v2684_v39  ;;  %v1730_v46 = vadd.f32 -96.0, %v2686_v40  ;;  %v2699_v47 = vcvt.s32.f32 %v182_v41  ;;  %v2701_v48 = vcvt.s32.f32 %v183_v42  ;;  %vm2219_vm13 = vmpackc.low %vm555_vm12, %vm554_vm11 }
  0x58   :  { %v2705_v49 = vcvt.s32.f32 %v184_v43  ;;  %v2707_v50 = vcvt.s32.f32 %v185_v44  ;;  %v186_v55 = vadd.s32 112, %v2637_v3  ;;  %v187_v56 = vadd.s32 120, %v2637_v3 }
  0x59   :  { %2214 = vmatpush3.bf16.msk.msra.mxu1 %vm2213_vm7, %v2530_v34  ;;  %vm556_vm14 = vcmp.eq.f32.partialorder %v1729_v45, %v2643_v7  ;;  %vm557_vm15 = vcmp.eq.f32.partialorder %v1730_v46, %v2643_v7  ;;  %v1731_v51 = vadd.f32 -96.0, %v2699_v47  ;;  %v1732_v52 = vadd.f32 -96.0, %v2701_v48 }
  0x5a   :  { %2215 = vmatprep.subr.bf16.mxu1 %v2527_v0  ;;  %vm2222_vm1 = vmpackc.low %vm557_vm15, %vm556_vm14  ;;  %v1733_v53 = vadd.f32 -96.0, %v2705_v49  ;;  %v1734_v54 = vadd.f32 -96.0, %v2707_v50  ;;  %v2729_v57 = vcvt.s32.f32 %v186_v55  ;;  %v2731_v58 = vcvt.s32.f32 %v187_v56 }
  0x5b   :  { %vm558_vm2 = vcmp.eq.f32.partialorder %v1731_v51, %v2643_v7  ;;  %vm559_vm3 = vcmp.eq.f32.partialorder %v1732_v52, %v2643_v7  ;;  %v101_v61 = vadd.f32 0.5, %v2641_v6  ;;  %v102_v62 = vadd.f32 0.5, %v2650_v16 }
  0x5c   :  { %vm2225_vm4 = vmpackc.low %vm559_vm3, %vm558_vm2  ;;  %vm560_vm5 = vcmp.eq.f32.partialorder %v1733_v53, %v2643_v7  ;;  %vm561_vm7 = vcmp.eq.f32.partialorder %v1734_v54, %v2643_v7  ;;  %v1735_v59 = vadd.f32 -96.0, %v2729_v57  ;;  %v1736_v60 = vadd.f32 -96.0, %v2731_v58 }
  0x5d   :  { %2217 = vmatpush3.bf16.msk.msra.mxu1 %vm2216_vm10, %v2530_v34  ;;  %vm2228_vm8 = vmpackc.low %vm561_vm7, %vm560_vm5  ;;  %v103_v63 = vadd.f32 0.5, %v2653_v18  ;;  %vm196_vm12 = vcmp.lt.f32.partialorder %v2641_v6, 32.0  ;;  %vm212_vm14 = vcmp.ge.f32.partialorder %v2643_v7, 32.0  ;;  %vm229_vm15 = vcmp.lt.f32.partialorder %v2643_v7, 64.0 }
  0x5e   :  { %2218 = vmatprep.subr.bf16.mxu1 %v2527_v0  ;;  %vm562_vm9 = vcmp.eq.f32.partialorder %v1735_v59, %v2643_v7  ;;  %vm563_vm10 = vcmp.eq.f32.partialorder %v1736_v60, %v2643_v7  ;;  %v104_v2 = vadd.f32 0.5, %v2656_v22  ;;  %v1704_v3 = vadd.f32 -32.0, %v2643_v7 }
  0x5f   :  { %vm2231_vm11 = vmpackc.low %vm563_vm10, %vm562_vm9  ;;  %vm198_vm3 = vcmp.lt.f32.partialorder %v2653_v18, 32.0  ;;  %v109_v4 = vmul.f32 0.125, %v101_v61  ;;  %v110_v5 = vmul.f32 0.125, %v102_v62  ;;  %vm199_vm5 = vcmp.lt.f32.partialorder %v2656_v22, 32.0 }
  0x60   :  { %v271_v9 = vadd.f32 0.5, %v1704_v3  ;;  %v111_v10 = vmul.f32 0.125, %v103_v63  ;;  %v112_v12 = vmul.f32 0.125, %v104_v2  ;;  %v105_v14 = vadd.f32 0.5, %v2658_v23  ;;  %vm216_vm9 = vmand %vm199_vm5, %vm212_vm14 }
  0x61   :  { %2220 = vmatpush3.bf16.msk.msra.mxu1 %vm2219_vm13, %v2530_v34  ;;  %vm197_vm13 = vcmp.lt.f32.partialorder %v2650_v16, 32.0  ;;  %vm200_vm10 = vcmp.lt.f32.partialorder %v2658_v23, 32.0  ;;  %v2771_v15 = vfloor.f32 %v109_v4  ;;  %v2773_v17 = vfloor.f32 %v110_v5 }
  0x62   :  { %2221 = vmatprep.subr.bf16.mxu1 %v2527_v0  ;;  %vm214_vm2 = vmand %vm197_vm13, %vm212_vm14  ;;  %v272_v13 = vmul.f32 0.125, %v271_v9  ;;  %v106_v19 = vadd.f32 0.5, %v2660_v24  ;;  %v2784_v25 = vfloor.f32 %v111_v10  ;;  %v2792_v27 = vfloor.f32 %v112_v12  ;;  %v1737_v9 = vld [vmem:[%s3635_s2] ss:$0 sm:$0xff] }
  0x63   :  { %vm2761_vm7 = vmand %vm214_vm2, %vm229_vm15  ;;  %v113_v29 = vmul.f32 0.125, %v105_v14  ;;  %v107_v33 = vadd.f32 0.5, %v2668_v31  ;;  %v108_v37 = vadd.f32 0.5, %v2673_v32  ;;  %v246_v43 = vadd.f32 0.5, %v2684_v39 }
  0x64   :  { %v2776_v20 = vfloor.f32 %v272_v13  ;;  %vm2800_vm2 = vmand %vm200_vm10, %vm212_vm14  ;;  %v114_v30 = vmul.f32 0.125, %v106_v19  ;;  %v247_v44 = vadd.f32 0.5, %v2686_v40  ;;  %v248_v53 = vadd.f32 0.5, %v2699_v47 }
  0x65   :  { %2223 = vmatpush3.bf16.msk.msra.mxu1 %vm2222_vm1, %v2530_v34  ;;  %vm213_vm1 = vmand %vm196_vm12, %vm212_vm14  ;;  %v2821_v36 = vfloor.f32 %v113_v29  ;;  %v115_v41 = vmul.f32 0.125, %v107_v33  ;;  %v116_v42 = vmul.f32 0.125, %v108_v37  ;;  %v2856_v51 = vmul.f32 0.125, %v246_v43 }
  0x66   :  { %2224 = vmatprep.subr.bf16.mxu1 %v2527_v0  ;;  %vm2788_vm12 = vmand %vm216_vm9, %vm229_vm15  ;;  %vm274_vm13 = vcmp.eq.f32.partialorder %v2771_v15, %v2776_v20  ;;  %vm276_vm5 = vcmp.eq.f32.partialorder %v2784_v25, %v2776_v20  ;;  %vm277_vm9 = vcmp.eq.f32.partialorder %v2792_v27, %v2776_v20  ;;  %v2827_v38 = vfloor.f32 %v114_v30 }
  0x67   :  { %v2849_v45 = vfloor.f32 %v115_v41  ;;  %v2851_v46 = vfloor.f32 %v116_v42  ;;  %v2863_v52 = vmul.f32 0.125, %v247_v44  ;;  %v262_v54 = vfloor.f32 %v2856_v51 }
  0x68   :  { %v249_v55 = vadd.f32 0.5, %v2701_v48  ;;  %v2880_v59 = vmul.f32 0.125, %v248_v53  ;;  %v250_v61 = vadd.f32 0.5, %v2705_v49  ;;  %v251_v63 = vadd.f32 0.5, %v2707_v50 }
  0x69   :  { %2226 = vmatpush3.bf16.msk.msra.mxu1 %vm2225_vm4, %v2530_v34  ;;  %vm2754_vm4 = vmand %vm213_vm1, %vm229_vm15  ;;  %vm275_vm1 = vcmp.eq.f32.partialorder %v2773_v17, %v2776_v20  ;;  %v263_v56 = vfloor.f32 %v2863_v52  ;;  %v252_v33 = vadd.f32 0.5, %v2729_v57  ;;  %v253_v35 = vadd.f32 0.5, %v2731_v58 }
  0x6a   :  { %2227 = vmatprep.subr.bf16.mxu1 %v2527_v0  ;;  %v2888_v60 = vmul.f32 0.125, %v249_v55  ;;  %v264_v62 = vfloor.f32 %v2880_v59  ;;  %v2906_v3 = vmul.f32 0.125, %v250_v61  ;;  %v2914_v4 = vmul.f32 0.125, %v251_v63 }
  0x6b   :  { %v2982_v37 = vmul.f32 0.125, %v252_v33  ;;  %v2984_v41 = vmul.f32 0.125, %v253_v35  ;;  %v147_v44 = vmul.f32 8.0, %v2773_v17  ;;  %v146_v53 = vmul.f32 8.0, %v2771_v15 }
  0x6c   :  { %v265_v2 = vfloor.f32 %v2888_v60  ;;  %v266_v5 = vfloor.f32 %v2906_v3  ;;  %v267_v8 = vfloor.f32 %v2914_v4  ;;  %v149_v55 = vmul.f32 8.0, %v2792_v27 }
  0x6d   :  { %2229 = vmatpush3.bf16.msk.msra.mxu1 %vm2228_vm8, %v2530_v34  ;;  %vm215_vm8 = vmand %vm198_vm3, %vm212_vm14  ;;  %v268_v42 = vfloor.f32 %v2982_v37  ;;  %v269_v43 = vfloor.f32 %v2984_v41  ;;  %v148_v61 = vmul.f32 8.0, %v2784_v25  ;;  %v150_v63 = vmul.f32 8.0, %v2821_v36 }
  0x6e   :  { %2230 = vmatprep.subr.bf16.mxu1 %v2527_v0  ;;  %vm290_vm3 = vmand %vm2754_vm4, %vm274_vm13  ;;  %vm201_vm4 = vcmp.lt.f32.partialorder %v2660_v24, 32.0 }
  0x71   :  { %2232 = vmatpush3.bf16.msk.msra.mxu1 %vm2231_vm11, %v2530_v34  ;;  %vm2780_vm11 = vmand %vm215_vm8, %vm229_vm15 }
  0x72   :  { %vm291_vm8 = vmand %vm2761_vm7, %vm275_vm1  ;;  %vm278_vm1 = vcmp.eq.f32.partialorder %v2821_v36, %v2776_v20 }
  0x73   :  { %vm2233_vm6 = vmpackc.low %vm291_vm8, %vm290_vm3  ;;  %vm202_vm8 = vcmp.lt.f32.partialorder %v2668_v31, 32.0 }
  0x74   :  { %2234 = vmatprep.subr.msk.bf16.mxu0 %vm2233_vm6, %v2530_v34  ;;  %vm2816_vm10 = vmand %vm2780_vm11, %vm276_vm5 }
  0x75   :  { %2236 = vmatpush3.bf16.msk.msra.mxu0 %vm2233_vm6, %v2530_v34  ;;  %vm293_vm7 = vmand %vm2788_vm12, %vm277_vm9  ;;  %vm279_vm12 = vcmp.eq.f32.partialorder %v2827_v38, %v2776_v20 }
  0x76   :  { %vm2237_vm13 = vmpackc.low %vm293_vm7, %vm2816_vm10  ;;  %vm203_vm10 = vcmp.lt.f32.partialorder %v2673_v32, 32.0 }
  0x77   :  { %2238 = vmatprep.subr.msk.bf16.mxu0 %vm2237_vm13, %v2530_v34  ;;  %vm218_vm11 = vmand %vm201_vm4, %vm212_vm14 }
  0x78   :  { %vm234_vm6 = vmand %vm2800_vm2, %vm229_vm15 }
  0x79   :  { %2240 = vmatpush3.bf16.msk.msra.mxu0 %vm2237_vm13, %v2530_v34  ;;  %vm235_vm3 = vmand %vm218_vm11, %vm229_vm15  ;;  %vm280_vm13 = vcmp.eq.f32.partialorder %v2849_v45, %v2776_v20 }
  0x7a   :  { %vm294_vm5 = vmand %vm234_vm6, %vm278_vm1  ;;  %vm281_vm1 = vcmp.eq.f32.partialorder %v2851_v46, %v2776_v20 }
  0x7b   :  { %vm295_vm9 = vmand %vm235_vm3, %vm279_vm12  ;;  %vm204_vm3 = vcmp.lt.f32.partialorder %v2684_v39, 32.0 }
  0x7c   :  { %vm2241_vm2 = vmpackc.low %vm295_vm9, %vm294_vm5 }
  0x7d   :  { %2242 = vmatprep.subr.msk.bf16.mxu0 %vm2241_vm2, %v2530_v34  ;;  %vm219_vm4 = vmand %vm202_vm8, %vm212_vm14  ;;  %vm205_vm8 = vcmp.lt.f32.partialorder %v2686_v40, 32.0 }
  0x7e   :  { %2244 = vmatpush3.bf16.msk.msra.mxu0 %vm2241_vm2, %v2530_v34  ;;  %vm220_vm7 = vmand %vm203_vm10, %vm212_vm14 }
  0x7f   :  { %vm236_vm11 = vmand %vm219_vm4, %vm229_vm15  ;;  %vm282_vm4 = vcmp.eq.f32.partialorder %v262_v54, %v2776_v20 }
  0x80   :  { %vm237_vm6 = vmand %vm220_vm7, %vm229_vm15 }
  0x81   :  { %vm296_vm12 = vmand %vm236_vm11, %vm280_vm13  ;;  %vm283_vm13 = vcmp.eq.f32.partialorder %v263_v56, %v2776_v20 }
  0x82   :  { %vm297_vm5 = vmand %vm237_vm6, %vm281_vm1  ;;  %vm206_vm6 = vcmp.lt.f32.partialorder %v2699_v47, 32.0 }
  0x83   :  { %vm2245_vm9 = vmpackc.low %vm297_vm5, %vm296_vm12 }
  0x84   :  { %2246 = vmatprep.subr.msk.bf16.mxu0 %vm2245_vm9, %v2530_v34  ;;  %vm221_vm10 = vmand %vm204_vm3, %vm212_vm14  ;;  %vm207_vm3 = vcmp.lt.f32.partialorder %v2701_v48, 32.0 }
  0x85   :  { %2248 = vmatpush3.bf16.msk.msra.mxu0 %vm2245_vm9, %v2530_v34  ;;  %vm222_vm2 = vmand %vm205_vm8, %vm212_vm14 }
  0x86   :  { %vm238_vm7 = vmand %vm221_vm10, %vm229_vm15  ;;  %vm284_vm10 = vcmp.eq.f32.partialorder %v264_v62, %v2776_v20 }
  0x87   :  { %vm239_vm11 = vmand %vm222_vm2, %vm229_vm15 }
  0x88   :  { %vm298_vm1 = vmand %vm238_vm7, %vm282_vm4  ;;  %vm285_vm4 = vcmp.eq.f32.partialorder %v265_v2, %v2776_v20 }
  0x89   :  { %vm299_vm12 = vmand %vm239_vm11, %vm283_vm13  ;;  %vm208_vm11 = vcmp.lt.f32.partialorder %v2705_v49, 32.0 }
  0x8a   :  { %vm2249_vm5 = vmpackc.low %vm299_vm12, %vm298_vm1 }
  0x8b   :  { %2250 = vmatprep.subr.msk.bf16.mxu0 %vm2249_vm5, %v2530_v34  ;;  %vm223_vm8 = vmand %vm206_vm6, %vm212_vm14  ;;  %vm209_vm6 = vcmp.lt.f32.partialorder %v2707_v50, 32.0 }
  0x8c   :  { %2252 = vmatpush3.bf16.msk.msra.mxu0 %vm2249_vm5, %v2530_v34  ;;  %vm224_vm9 = vmand %vm207_vm3, %vm212_vm14 }
  0x8d   :  { %vm240_vm2 = vmand %vm223_vm8, %vm229_vm15  ;;  %vm286_vm8 = vcmp.eq.f32.partialorder %v266_v5, %v2776_v20 }
  0x8e   :  { %vm241_vm7 = vmand %vm224_vm9, %vm229_vm15 }
  0x8f   :  { %vm300_vm13 = vmand %vm240_vm2, %vm284_vm10  ;;  %vm287_vm10 = vcmp.eq.f32.partialorder %v267_v8, %v2776_v20 }
  0x90   :  { %vm301_vm1 = vmand %vm241_vm7, %vm285_vm4 }
  0x91   :  { %vm2253_vm12 = vmpackc.low %vm301_vm1, %vm300_vm13  ;;  %vm3644_vm1 = vcmask 64512  }
  0x92   :  { %2254 = vmatprep.subr.msk.bf16.mxu0 %vm2253_vm12, %v2530_v34  ;;  %vm225_vm3 = vmand %vm208_vm11, %vm212_vm14  ;;  %vm125_vm11 = vcmp.eq.f32.partialorder %v2771_v15, %v2643_v7 }
  0x93   :  { %2256 = vmatpush3.bf16.msk.msra.mxu0 %vm2253_vm12, %v2530_v34  ;;  %vm226_vm5 = vmand %vm209_vm6, %vm212_vm14  ;;  %v133_v13 = vsel %vm125_vm11, 1.0, %v2529_v1  ;;  %vm126_vm6 = vcmp.eq.f32.partialorder %v2773_v17, %v2643_v7  ;;  %vm127_vm12 = vcmp.eq.f32.partialorder %v2784_v25, %v2643_v7  ;;  %vm288_vm11 = vcmp.eq.f32.partialorder %v268_v42, %v2776_v20 }
  0x94   :  { %vm242_vm9 = vmand %vm225_vm3, %vm229_vm15  ;;  %v134_v14 = vsel %vm126_vm6, 1.0, %v2529_v1  ;;  %v135_v19 = vsel %vm127_vm12, 1.0, %v2529_v1  ;;  %vm128_vm3 = vcmp.eq.f32.partialorder %v2792_v27, %v2643_v7  ;;  %vm289_vm12 = vcmp.eq.f32.partialorder %v269_v43, %v2776_v20 }
  0x95   :  { %vm243_vm2 = vmand %vm226_vm5, %vm229_vm15  ;;  %vm129_vm5 = vcmp.eq.f32.partialorder %v2821_v36, %v2643_v7  ;;  %v136_v21 = vsel %vm128_vm3, 1.0, %v2529_v1  ;;  %v151_v20 = vmul.f32 8.0, %v2827_v38  ;;  %v3022_v17 = vsub.f32 %v2653_v18, %v148_v61 }
  0x96   :  { %vm302_vm4 = vmand %vm242_vm9, %vm286_vm8  ;;  %v137_v26 = vsel %vm129_vm5, 1.0, %v2529_v1  ;;  %vm130_vm8 = vcmp.eq.f32.partialorder %v2827_v38, %v2643_v7  ;;  %vm131_vm9 = vcmp.eq.f32.partialorder %v2849_v45, %v2643_v7  ;;  %v3028_v25 = vsub.f32 %v2658_v23, %v150_v63 }
  0x97   :  { %vm303_vm7 = vmand %vm243_vm2, %vm287_vm10  ;;  %v138_v28 = vsel %vm130_vm8, 1.0, %v2529_v1  ;;  %v139_v29 = vsel %vm131_vm9, 1.0, %v2529_v1  ;;  %vm132_vm10 = vcmp.eq.f32.partialorder %v2851_v46, %v2643_v7  ;;  %vm210_vm2 = vcmp.lt.f32.partialorder %v2729_v57, 32.0 }
  0x98   :  { %vm2257_vm13 = vmpackc.low %vm303_vm7, %vm302_vm4  ;;  %v140_v30 = vsel %vm132_vm10, 1.0, %v2529_v1  ;;  %vm211_vm4 = vcmp.lt.f32.partialorder %v2731_v58, 32.0  ;;  %v3025_v15 = vsub.f32 %v2660_v24, %v151_v20  ;;  %v153_v27 = vmul.f32 8.0, %v2851_v46 }
  0x99   :  { %2258 = vmatprep.subr.msk.bf16.mxu0 %vm2257_vm13, %v2530_v34  ;;  %vm227_vm7 = vmand %vm210_vm2, %vm212_vm14  ;;  %v152_v36 = vmul.f32 8.0, %v2849_v45  ;;  %vm340_vm10 = vcmp.eq.f32.partialorder %v3022_v17, %v2643_v7  ;;  %v2531_v38 = vmov 0.5|0.5   ;;  %v322_v45 = vmul.f32 8.0, %v262_v54 }
  0x9a   :  { %2260 = vmatpush3.bf16.msk.msra.mxu0 %vm2257_vm13, %v2530_v34  ;;  %vm228_vm13 = vmand %vm211_vm4, %vm212_vm14  ;;  %v324_v54 = vmul.f32 8.0, %v264_v62 }
  0x9b   :  { %vm244_vm6 = vmand %vm227_vm7, %vm229_vm15  ;;  %v330_v51 = vsub.f32 %v2684_v39, %v322_v45 }
  0x9c   :  { %vm245_vm3 = vmand %vm228_vm13, %vm229_vm15  ;;  %vm342_vm13 = vcmp.eq.f32.partialorder %v3028_v25, %v2643_v7  ;;  %v332_v62 = vsub.f32 %v2699_v47, %v324_v54  ;;  %v328_v54 = vmul.f32 8.0, %v268_v42 }
  0x9d   :  { %vm304_vm5 = vmand %vm244_vm6, %vm288_vm11  ;;  %vm343_vm11 = vcmp.eq.f32.partialorder %v3025_v15, %v2643_v7 }
  0x9e   :  { %vm305_vm8 = vmand %vm245_vm3, %vm289_vm12 }
  0x9f   :  { %vm2261_vm9 = vmpackc.low %vm305_vm8, %vm304_vm5  ;;  %vm3088_vm8 = vcmp.eq.f32.partialorder %v330_v51, %v2643_v7 }
  0xa0   :  { %2262 = vmatprep.subr.msk.bf16.mxu0 %vm2261_vm9, %v2530_v34  ;;  %vm3063_vm6 = vmpackc.low %vm343_vm11, %vm342_vm13 }
  0xa1   :  { %2264 = vmatpush3.bf16.msk.msra.mxu0 %vm2261_vm9, %v2530_v34 }
 0x127   :  { %v661_v10 = vpop.f32.mrb[0].mxu0 }
 0x128   :  { %v662_v11 = vadd.f32 %v1737_v9, %v661_v10  ;;  %v1966_v12 = vpop.f32.mrb[1].mxu0  ;;  %v3013_v9 = vsub.f32 %v2650_v16, %v147_v44  ;;  %v3016_v10 = vsub.f32 %v2641_v6, %v146_v53 }
 0x129   :  { %v323_v12 = vmul.f32 8.0, %v263_v56  ;;  %v325_v56 = vmul.f32 8.0, %v265_v2 }
 0x12a   :  { %2000 = vmatmul.mubr.f32.vlgmr.msra.gmra.mrb[0].mxu1 %v662_v11  ;;  %2002 = vmatprep.subr.mxu1 %v662_v11  ;;  %vm338_vm14 = vcmp.eq.f32.partialorder %v3016_v10, %v2643_v7  ;;  %vm339_vm15 = vcmp.eq.f32.partialorder %v3013_v9, %v2643_v7 }
 0x12b   :  { %2003 = vmatpush3.msra.mxu1 %v662_v11  ;;  %2004 = vmatprep.mubr.msk.f32.mxu1 %vm3644_vm1, %v133_v13  ;;  %v3019_v11 = vsub.f32 %v2656_v22, %v149_v55  ;;  %vm2265_vm2 = vmpackc.low %vm339_vm15, %vm338_vm14  ;;  %v3054_v13 = vsub.f32 %v2673_v32, %v153_v27  ;;  %v331_v52 = vsub.f32 %v2686_v40, %v323_v12 }
 0x12c   :  { %2266 = vmatprep.subr.msk.bf16.mxu1 %vm2265_vm2, %v2531_v38  ;;  %v333_v2 = vsub.f32 %v2701_v48, %v325_v56  ;;  %vm348_vm15 = vcmp.eq.f32.partialorder %v332_v62, %v2643_v7  ;;  %v329_v56 = vmul.f32 8.0, %v269_v43 }
 0x12d   :  { %vm341_vm4 = vcmp.eq.f32.partialorder %v3019_v11, %v2643_v7  ;;  %vm345_vm3 = vcmp.eq.f32.partialorder %v3054_v13, %v2643_v7  ;;  %vm3093_vm9 = vcmp.eq.f32.partialorder %v331_v52, %v2643_v7 }
 0x12e   :  { %2005 = vmatmul.mubr.msk.f32.vlgmr.msra.gmra.mrb[2].mxu1 %vm3644_vm1, %v134_v14  ;;  %vm3041_vm7 = vmpackc.low %vm341_vm4, %vm340_vm10  ;;  %v3057_v14 = vsub.f32 %v2668_v31, %v152_v36  ;;  %vm349_vm10 = vcmp.eq.f32.partialorder %v333_v2, %v2643_v7 }
 0x12f   :  { %2007 = vmatprep.mubr.msk.f32.mxu1 %vm3644_vm1, %v135_v19  ;;  %2268 = vmatpush3.bf16.msk.msra.mxu1 %vm2265_vm2, %v2531_v38  ;;  %vm2281_vm14 = vmpackc.low %vm3093_vm9, %vm3088_vm8 }
 0x130   :  { %2270 = vmatprep.subr.msk.bf16.mxu1 %vm3041_vm7, %v2531_v38  ;;  %vm344_vm12 = vcmp.eq.f32.partialorder %v3057_v14, %v2643_v7  ;;  %vm2285_vm2 = vmpackc.low %vm349_vm10, %vm348_vm15 }
 0x131   :  { %vm2277_vm5 = vmpackc.low %vm345_vm3, %vm344_vm12 }
 0x132   :  { %2008 = vmatmul.mubr.msk.f32.gmra.mrb[4].mxu1 %vm3644_vm1, %v136_v21  ;;  %v326_v21 = vmul.f32 8.0, %v266_v5  ;;  %v141_v5 = vadd.f32 0.5, %v2643_v7 }
 0x133   :  { %2010 = vmatprep.mubr.msk.f32.mxu1 %vm3644_vm1, %v137_v26  ;;  %2272 = vmatpush3.bf16.msk.msra.mxu1 %vm3041_vm7, %v2531_v38  ;;  %v327_v26 = vmul.f32 8.0, %v267_v8 }
 0x134   :  { %2274 = vmatprep.subr.msk.bf16.mxu1 %vm3063_vm6, %v2531_v38  ;;  %v334_v3 = vsub.f32 %v2705_v49, %v326_v21  ;;  %v142_v8 = vmul.f32 0.125, %v141_v5  ;;  %v336_v21 = vsub.f32 %v2729_v57, %v328_v54 }
 0x135   :  { %v335_v4 = vsub.f32 %v2707_v50, %v327_v26  ;;  %v337_v26 = vsub.f32 %v2731_v58, %v329_v56 }
 0x136   :  { %2011 = vmatmul.mubr.msk.f32.gmra.mrb[6].mxu1 %vm3644_vm1, %v138_v28  ;;  %vm350_vm4 = vcmp.eq.f32.partialorder %v334_v3, %v2643_v7  ;;  %v3121_v28 = vfloor.f32 %v142_v8  ;;  %vm352_vm15 = vcmp.eq.f32.partialorder %v336_v21, %v2643_v7 }
 0x137   :  { %2013 = vmatprep.mubr.msk.f32.mxu1 %vm3644_vm1, %v139_v29  ;;  %2276 = vmatpush3.bf16.msk.msra.mxu1 %vm3063_vm6, %v2531_v38  ;;  %vm351_vm7 = vcmp.eq.f32.partialorder %v335_v4, %v2643_v7  ;;  %vm353_vm10 = vcmp.eq.f32.partialorder %v337_v26, %v2643_v7 }
 0x138   :  { %2278 = vmatprep.subr.msk.bf16.mxu1 %vm2277_vm5, %v2531_v38  ;;  %vm2289_vm13 = vmpackc.low %vm351_vm7, %vm350_vm4  ;;  %v162_v29 = vmul.f32 8.0, %v3121_v28  ;;  %vm372_vm7 = vcmp.ge.f32.partialorder %v2641_v6, 64.0 }
 0x13a   :  { %2014 = vmatmul.mubr.msk.f32.gmra.mrb[8].mxu1 %vm3644_vm1, %v140_v30  ;;  %v3125_v30 = vsub.f32 %v2643_v7, %v162_v29 }
 0x13b   :  { %2280 = vmatpush3.bf16.msk.msra.mxu1 %vm2277_vm5, %v2531_v38 }
 0x13c   :  { %2282 = vmatprep.subr.msk.bf16.mxu1 %vm2281_vm14, %v2531_v38  ;;  %vm164_vm11 = vcmp.eq.f32.partialorder %v3016_v10, %v3125_v30  ;;  %vm165_vm6 = vcmp.eq.f32.partialorder %v3013_v9, %v3125_v30  ;;  %vm166_vm12 = vcmp.eq.f32.partialorder %v3022_v17, %v3125_v30  ;;  %vm167_vm3 = vcmp.eq.f32.partialorder %v3019_v11, %v3125_v30 }
 0x13d   :  { %v3132_v33 = vsel %vm164_vm11, 1.0, %v2529_v1  ;;  %v3135_v35 = vsel %vm165_vm6, 1.0, %v2529_v1  ;;  %v3150_v20 = vsel %vm166_vm12, 1.0, %v2529_v1  ;;  %vm169_vm5 = vcmp.eq.f32.partialorder %v3025_v15, %v3125_v30 }
 0x13e   :  { %v3155_v63 = vsel %vm167_vm3, 1.0, %v2529_v1  ;;  %vm168_vm8 = vcmp.eq.f32.partialorder %v3028_v25, %v3125_v30  ;;  %v3166_v17 = vsel %vm169_vm5, 1.0, %v2529_v1  ;;  %vm171_vm9 = vcmp.eq.f32.partialorder %v3054_v13, %v3125_v30 }
 0x13f   :  { %2284 = vmatpush3.bf16.msk.msra.mxu1 %vm2281_vm14, %v2531_v38  ;;  %v3171_v27 = vsel %vm168_vm8, 1.0, %v2529_v1  ;;  %vm170_vm14 = vcmp.eq.f32.partialorder %v3057_v14, %v3125_v30  ;;  %v3186_v12 = vsel %vm171_vm9, 1.0, %v2529_v1  ;;  %vm370_vm4 = vcmp.eq.f32.partialorder %v3125_v30, %v2641_v6 }
 0x140   :  { %2286 = vmatprep.subr.msk.bf16.mxu1 %vm2285_vm2, %v2531_v38  ;;  %v3189_v13 = vsel %vm170_vm14, 1.0, %v2529_v1  ;;  %vm373_vm11 = vcmp.ge.f32.partialorder %v2650_v16, 64.0  ;;  %vm389_vm6 = vcmp.lt.f32.partialorder %v2650_v16, 96.0 }
 0x141   :  { %vm405_vm3 = vmand %vm373_vm11, %vm389_vm6  ;;  %vm392_vm11 = vcmp.lt.f32.partialorder %v2658_v23, 96.0 }
 0x143   :  { %2288 = vmatpush3.bf16.msk.msra.mxu1 %vm2285_vm2, %v2531_v38  ;;  %vm2293_vm2 = vmpackc.low %vm353_vm10, %vm352_vm15  ;;  %vm374_vm10 = vcmp.ge.f32.partialorder %v2653_v18, 64.0 }
 0x144   :  { %2290 = vmatprep.subr.msk.bf16.mxu1 %vm2289_vm13, %v2531_v38 }
 0x147   :  { %2292 = vmatpush3.bf16.msk.msra.mxu1 %vm2289_vm13, %v2531_v38  ;;  %vm388_vm13 = vcmp.lt.f32.partialorder %v2641_v6, 96.0 }
 0x148   :  { %2294 = vmatprep.subr.msk.bf16.mxu1 %vm2293_vm2, %v2531_v38  ;;  %vm404_vm12 = vmand %vm372_vm7, %vm388_vm13  ;;  %vm391_vm7 = vcmp.lt.f32.partialorder %v2656_v22, 96.0  ;;  %vm376_vm13 = vcmp.ge.f32.partialorder %v2658_v23, 64.0 }
 0x14b   :  { %2296 = vmatpush3.bf16.msk.msra.mxu1 %vm2293_vm2, %v2531_v38  ;;  %vm375_vm2 = vcmp.ge.f32.partialorder %v2656_v22, 64.0 }
 0x14c   :  { %2329 = vmatprep.subr.bf16.mxu1 %v2527_v0 }
 0x201   :  { %v3137_v44 = vpop.f32.mrb[2].mxu1 }
 0x202   :  { %v3141_v53 = vpop.f32.mrb[3].mxu1  ;;  %v866_v61 = vmul.f32 %v3137_v44, %v3135_v35 }
 0x203   :  { %v865_v55 = vmul.f32 %v3141_v53, %v3132_v33 }
 0x205   :  { %v3157_v9 = vpop.f32.mrb[4].mxu1  ;;  %2048 = vmatprep.mubr.f32.mxu0 %v865_v55 }
 0x206   :  { %v3161_v10 = vpop.f32.mrb[5].mxu1  ;;  %2049 = vmatmul.mubr.f32.vlgmr.msra.gmra.mrb[2].mxu0 %v866_v61  ;;  %v868_v15 = vmul.f32 %v3157_v9, %v3155_v63 }
 0x207   :  { %v867_v11 = vmul.f32 %v3161_v10, %v3150_v20 }
 0x209   :  { %v3175_v36 = vpop.f32.mrb[6].mxu1  ;;  %2051 = vmatprep.mubr.f32.mxu0 %v867_v11 }
 0x20a   :  { %v870_v25 = vmul.f32 %v3175_v36, %v3166_v17  ;;  %v3181_v46 = vpop.f32.mrb[7].mxu1  ;;  %2052 = vmatmul.mubr.f32.gmra.mrb[4].mxu0 %v868_v15 }
 0x20b   :  { %v869_v45 = vmul.f32 %v3181_v46, %v3171_v27 }
 0x20d   :  { %v3191_v19 = vpop.f32.mrb[8].mxu1  ;;  %2054 = vmatprep.mubr.f32.mxu0 %v869_v45 }
 0x20e   :  { %v872_v14 = vmul.f32 %v3191_v19, %v3186_v12  ;;  %v3195_v51 = vpop.f32.mrb[9].mxu1  ;;  %2055 = vmatmul.mubr.f32.gmra.mrb[6].mxu0 %v870_v25 }
 0x20f   :  { %v871_v52 = vmul.f32 %v3195_v51, %v3189_v13 }
 0x211   :  { %2057 = vmatprep.mubr.f32.mxu0 %v871_v52 }
 0x212   :  { %2058 = vmatmul.mubr.f32.gmra.mrb[8].mxu0 %v872_v14 }
 0x2d9   :  { %v2050_v37 = vpop.f32.mrb[2].mxu0 }
 0x2da   :  { %v979_v42 = vmul.f32 %v2050_v37, %v3137_v44  ;;  %v939_v41 = vpop.f32.mrb[3].mxu0 }
 0x2db   :  { %v978_v43 = vmul.f32 %v939_v41, %v3141_v53 }
 0x2dd   :  { %v2053_v59 = vpop.f32.mrb[4].mxu0  ;;  %2092 = vmatprep.mubr.f32.mxu1 %v978_v43 }
 0x2de   :  { %v981_v60 = vmul.f32 %v2053_v59, %v3157_v9  ;;  %v949_v62 = vpop.f32.mrb[5].mxu0  ;;  %2093 = vmatmul.mubr.f32.vlgmr.msra.gmra.mrb[10].mxu1 %v979_v42 }
 0x2df   :  { %v980_v7 = vmul.f32 %v949_v62, %v3161_v10 }
 0x2e1   :  { %v2056_v2 = vpop.f32.mrb[6].mxu0  ;;  %2095 = vmatprep.mubr.f32.mxu1 %v980_v7 }
 0x2e2   :  { %v983_v38 = vmul.f32 %v2056_v2, %v3175_v36  ;;  %v959_v3 = vpop.f32.mrb[7].mxu0  ;;  %2096 = vmatmul.mubr.f32.gmra.mrb[12].mxu1 %v981_v60 }
 0x2e3   :  { %v982_v4 = vmul.f32 %v959_v3, %v3181_v46 }
 0x2e5   :  { %v2059_v5 = vpop.f32.mrb[8].mxu0  ;;  %2098 = vmatprep.mubr.f32.mxu1 %v982_v4 }
 0x2e6   :  { %v985_v8 = vmul.f32 %v2059_v5, %v3191_v19  ;;  %v969_v29 = vpop.f32.mrb[9].mxu0  ;;  %2099 = vmatmul.mubr.f32.gmra.mrb[14].mxu1 %v983_v38 }
 0x2e7   :  { %v984_v55 = vmul.f32 %v969_v29, %v3195_v51 }
 0x2e9   :  { %2101 = vmatprep.mubr.f32.mxu1 %v984_v55 }
 0x2ea   :  { %2102 = vmatmul.mubr.f32.gmra.mrb[16].mxu1 %v985_v8 }
 0x2eb   :  { %2178 = vmatprep.mubr.msk.f32.mxu1 %vm3642_vm0, %v2529_v1  ;;  %vm395_vm0 = vcmp.lt.f32.partialorder %v2673_v32, 96.0 }
 0x3b1   :  { %v2094_v61 = vpop.f32.mrb[10].mxu1 }
 0x3b2   :  { %v1052_v11 = vpop.f32.mrb[11].mxu1  ;;  %v1094_v14 = vsel %vm3644_vm1, %v2094_v61, -inf }
 0x3b3   :  { %v1091_v15 = vsel %vm3644_vm1, %v1052_v11, -inf }
 0x3b4   :  { %1092 = vmax.xlane.f32.xlu0 %v1091_v15 }
 0x3b5   :  { %v2097_v25 = vpop.f32.mrb[12].mxu1 }
 0x3b6   :  { %v1062_v45 = vpop.f32.mrb[13].mxu1  ;;  %v1100_v21 = vsel %vm3644_vm1, %v2097_v25, -inf }
 0x3b7   :  { %v1097_v52 = vsel %vm3644_vm1, %v1062_v45, -inf }
 0x3b8   :  { %1095 = vmax.xlane.f32.xlu0 %v1094_v14  ;;  %1098 = vmax.xlane.f32.xlu1 %v1097_v52 }
 0x3b9   :  { %v2100_v54 = vpop.f32.mrb[14].mxu1 }
 0x3ba   :  { %v1072_v56 = vpop.f32.mrb[15].mxu1  ;;  %v1106_v41 = vsel %vm3644_vm1, %v2100_v54, -inf }
 0x3bb   :  { %v1103_v26 = vsel %vm3644_vm1, %v1072_v56, -inf }
 0x3bc   :  { %1101 = vmax.xlane.f32.xlu1 %v1100_v21  ;;  %1104 = vmax.xlane.f32.xlu0 %v1103_v26 }
 0x3bd   :  { %v2103_v37 = vpop.f32.mrb[16].mxu1 }
 0x3be   :  { %v1082_v42 = vpop.f32.mrb[17].mxu1  ;;  %v1112_v59 = vsel %vm3644_vm1, %v2103_v37, -inf }
 0x3bf   :  { %v1109_v43 = vsel %vm3644_vm1, %v1082_v42, -inf }
 0x3c0   :  { %1107 = vmax.xlane.f32.xlu1 %v1106_v41  ;;  %1110 = vmax.xlane.f32.xlu0 %v1109_v43 }
 0x3c4   :  { %1113 = vmax.xlane.f32.xlu1 %v1112_v59 }
 0x441   :  { %v1093_v60 = vpop.xlane.xlu0 %1092 }
 0x442   :  { %v1115_v62 = vsub.f32 %v1052_v11, %v1093_v60 }
 0x444   :  { %v1123_v7 = vmul.f32 1.442695, %v1115_v62 }
 0x445   :  { %v1096_v2 = vpop.xlane.xlu0 %1095  ;;  %v1099_v38 = vpop.xlane.xlu1 %1098 }
 0x446   :  { %2369 = vpow2.f32 %v1123_v7  ;;  %v1116_v3 = vsub.f32 %v2094_v61, %v1096_v2  ;;  %v1117_v4 = vsub.f32 %v1062_v45, %v1099_v38 }
 0x448   :  { %v1125_v5 = vmul.f32 1.442695, %v1116_v3  ;;  %v1127_v8 = vmul.f32 1.442695, %v1117_v4 }
 0x449   :  { %v1102_v29 = vpop.xlane.xlu1 %1101  ;;  %v1105_v55 = vpop.xlane.xlu0 %1104 }
 0x44a   :  { %2371 = vpow2.f32 %v1125_v5  ;;  %v1118_v15 = vsub.f32 %v2097_v25, %v1102_v29  ;;  %v1119_v14 = vsub.f32 %v1072_v56, %v1105_v55 }
 0x44b   :  { %2373 = vpow2.f32 %v1127_v8 }
 0x44c   :  { %v1129_v52 = vmul.f32 1.442695, %v1118_v15  ;;  %v1131_v21 = vmul.f32 1.442695, %v1119_v14 }
 0x44d   :  { %v1108_v26 = vpop.xlane.xlu1 %1107  ;;  %v1111_v41 = vpop.xlane.xlu0 %1110 }
 0x44e   :  { %2375 = vpow2.f32 %v1129_v52  ;;  %v1120_v11 = vsub.f32 %v2100_v54, %v1108_v26  ;;  %v1121_v43 = vsub.f32 %v1082_v42, %v1111_v41  ;;  %v2532_v52 = vmov 1.0  }
 0x44f   :  { %2377 = vpow2.f32 %v1131_v21  ;;  %2104 = vmatprep.subr.msk.mxu0 %vm370_vm4, %v2532_v52  ;;  %v1705_v21 = vadd.f32 -64.0, %v2641_v6  ;;  %v1706_v26 = vadd.f32 -64.0, %v2650_v16  ;;  %v1707_v16 = vadd.f32 -64.0, %v2653_v18 }
 0x450   :  { %v3228_v59 = vpop.eup %2369  ;;  %v1133_v61 = vmul.f32 1.442695, %v1120_v11  ;;  %v1135_v45 = vmul.f32 1.442695, %v1121_v43  ;;  %2105 = vmatpush3.msk.msra.mxu0 %vm370_vm4, %v2532_v52  ;;  %v1712_v52 = vadd.f32 -64.0, %v2673_v32  ;;  %vm390_vm4 = vcmp.lt.f32.partialorder %v2653_v18, 96.0 }
 0x451   :  { %v1114_v60 = vpop.xlane.xlu1 %1113  ;;  %v1139_v62 = vsel %vm3644_vm1, %v3228_v59, 0.0  ;;  %v436_v41 = vadd.f32 0.5, %v1705_v21  ;;  %v437_v11 = vadd.f32 0.5, %v1706_v26  ;;  %vm3295_vm6 = vmand %vm374_vm10, %vm390_vm4 }
 0x452   :  { %2379 = vpow2.f32 %v1133_v61  ;;  %v1122_v25 = vsub.f32 %v2103_v37, %v1114_v60  ;;  %1140 = vadd.xlane.f32.xlu0 %v1139_v62  ;;  %v1708_v62 = vadd.f32 -64.0, %v2656_v22  ;;  %vm3318_vm10 = vmand %vm376_vm13, %vm392_vm11 }
 0x453   :  { %2381 = vpow2.f32 %v1135_v45  ;;  %v452_v30 = vmul.f32 0.125, %v436_v41  ;;  %v453_v43 = vmul.f32 0.125, %v437_v11 }
 0x454   :  { %v3232_v56 = vpop.eup %2371  ;;  %v1137_v7 = vmul.f32 1.442695, %v1122_v25  ;;  %v1709_v25 = vadd.f32 -64.0, %v2658_v23 }
 0x455   :  { %v3234_v2 = vpop.eup %2373  ;;  %v1142_v54 = vsel %vm3644_vm1, %v3232_v56, 0.0  ;;  %v468_v61 = vfloor.f32 %v452_v30  ;;  %v469_v45 = vfloor.f32 %v453_v43 }
 0x456   :  { %2383 = vpow2.f32 %v1137_v7  ;;  %1143 = vadd.xlane.f32.xlu1 %v1142_v54  ;;  %v1145_v42 = vsel %vm3644_vm1, %v3234_v2, 0.0  ;;  %v1710_v7 = vadd.f32 -64.0, %v2660_v24  ;;  %v438_v54 = vadd.f32 0.5, %v1707_v16 }
 0x457   :  { %1146 = vadd.xlane.f32.xlu0 %v1145_v42  ;;  %vm484_vm5 = vcmp.eq.f32.partialorder %v468_v61, %v3121_v28  ;;  %vm485_vm8 = vcmp.eq.f32.partialorder %v469_v45, %v3121_v28  ;;  %v439_v42 = vadd.f32 0.5, %v1708_v62  ;;  %v443_v61 = vadd.f32 0.5, %v1712_v52 }
 0x458   :  { %v3240_v38 = vpop.eup %2375  ;;  %vm500_vm9 = vmand %vm404_vm12, %vm484_vm5  ;;  %v1713_v45 = vadd.f32 -64.0, %v2684_v39  ;;  %vm377_vm12 = vcmp.ge.f32.partialorder %v2660_v24, 64.0 }
 0x459   :  { %v3242_v3 = vpop.eup %2377  ;;  %v1148_v37 = vsel %vm3644_vm1, %v3240_v38, 0.0  ;;  %vm501_vm14 = vmand %vm405_vm3, %vm485_vm8  ;;  %v455_v21 = vmul.f32 0.125, %v439_v42  ;;  %vm393_vm3 = vcmp.lt.f32.partialorder %v2660_v24, 96.0  ;;  %vm378_vm8 = vcmp.ge.f32.partialorder %v2668_v31, 64.0 }
 0x45a   :  { %1149 = vadd.xlane.f32.xlu1 %v1148_v37  ;;  %v1151_v4 = vsel %vm3644_vm1, %v3242_v3, 0.0  ;;  %vm3270_vm15 = vmpackc.low %vm501_vm14, %vm500_vm9  ;;  %v440_v37 = vadd.f32 0.5, %v1709_v25  ;;  %v1714_v25 = vadd.f32 -64.0, %v2686_v40  ;;  %vm394_vm9 = vcmp.lt.f32.partialorder %v2668_v31, 96.0 }
 0x45b   :  { %1152 = vadd.xlane.f32.xlu0 %v1151_v4  ;;  %2298 = vmatprep.subr.msk.bf16.mxu0 %vm3270_vm15, %v2530_v34  ;;  %v441_v4 = vadd.f32 0.5, %v1710_v7  ;;  %v471_v62 = vfloor.f32 %v455_v21  ;;  %vm3305_vm5 = vmand %vm375_vm2, %vm391_vm7  ;;  %v1716_v24 = vadd.f32 -64.0, %v2701_v48  ;;  %v1718_v7 = vadd.f32 -64.0, %v2707_v50 }
 0x45c   :  { %v3248_v5 = vpop.eup %2379  ;;  %v456_v26 = vmul.f32 0.125, %v440_v37  ;;  %vm3331_vm4 = vmand %vm377_vm12, %vm393_vm3  ;;  %v445_v23 = vadd.f32 0.5, %v1714_v25 }
 0x45d   :  { %v3250_v8 = vpop.eup %2381  ;;  %v1154_v29 = vsel %vm3644_vm1, %v3248_v5, 0.0  ;;  %v457_v41 = vmul.f32 0.125, %v441_v4  ;;  %vm3323_vm2 = vcmp.eq.f32.partialorder %v471_v62, %v3121_v28  ;;  %vm3345_vm13 = vmand %vm378_vm8, %vm394_vm9 }
 0x45e   :  { %1155 = vadd.xlane.f32.xlu1 %v1154_v29  ;;  %v1157_v55 = vsel %vm3644_vm1, %v3250_v8, 0.0  ;;  %v1711_v29 = vadd.f32 -64.0, %v2668_v31  ;;  %vm503_vm3 = vmand %vm3305_vm5, %vm3323_vm2  ;;  %vm396_vm2 = vcmp.lt.f32.partialorder %v2684_v39, 96.0 }
 0x45f   :  { %1158 = vadd.xlane.f32.xlu0 %v1157_v55  ;;  %v473_v37 = vfloor.f32 %v457_v41  ;;  %v1715_v41 = vadd.f32 -64.0, %v2699_v47 }
 0x460   :  { %v3256_v15 = vpop.eup %2383  ;;  %v442_v11 = vadd.f32 0.5, %v1711_v29 }
 0x461   :  { %v1160_v14 = vsel %vm3644_vm1, %v3256_v15, 0.0  ;;  %vm3355_vm12 = vcmp.eq.f32.partialorder %v473_v37, %v3121_v28  ;;  %v461_v37 = vmul.f32 0.125, %v445_v23 }
 0x462   :  { %1161 = vadd.xlane.f32.xlu1 %v1160_v14  ;;  %v454_v14 = vmul.f32 0.125, %v438_v54  ;;  %v472_v54 = vfloor.f32 %v456_v26  ;;  %v458_v18 = vmul.f32 0.125, %v442_v11  ;;  %v449_v11 = vadd.f32 0.5, %v1718_v7 }
 0x464   :  { %v470_v43 = vfloor.f32 %v454_v14  ;;  %v444_v14 = vadd.f32 0.5, %v1713_v45  ;;  %vm3337_vm7 = vcmp.eq.f32.partialorder %v472_v54, %v3121_v28  ;;  %v474_v45 = vfloor.f32 %v458_v18 }
 0x465   :  { %v447_v18 = vadd.f32 0.5, %v1716_v24 }
 0x466   :  { %vm3312_vm14 = vcmp.eq.f32.partialorder %v470_v43, %v3121_v28  ;;  %v460_v25 = vmul.f32 0.125, %v444_v14  ;;  %vm3391_vm8 = vcmp.eq.f32.partialorder %v474_v45, %v3121_v28 }
 0x467   :  { %vm502_vm11 = vmand %vm3295_vm6, %vm3312_vm14  ;;  %vm3689_vm6 = vcmp.ge.f32.partialorder %v2673_v32, 64.0 }
 0x468   :  { %vm3402_vm5 = vmand %vm3689_vm6, %vm395_vm0  ;;  %v476_v24 = vfloor.f32 %v460_v25  ;;  %vm3698_vm6 = vcmask 64512  }
 0x469   :  { %vm3695_vm0 = vmand %vm3331_vm4, %vm3355_vm12 }
 0x46a   :  { %vm506_vm9 = vmand %vm3345_vm13, %vm3391_vm8  ;;  %vm383_vm8 = vcmp.ge.f32.partialorder %v2701_v48, 64.0 }
 0x46b   :  { %vm3699_vm4 = vmmov %vm3698_vm6 }
 0x4df   :  { %v1141_v55 = vpop.xlane.xlu0 %1140 }
 0x4e0   :  { %2385 = vrcp.f32 %v1141_v55  ;;  %v459_v55 = vmul.f32 0.125, %v443_v61 }
 0x4e2   :  { %v475_v62 = vfloor.f32 %v459_v55 }
 0x4e3   :  { %v1144_v30 = vpop.xlane.xlu1 %1143 }
 0x4e4   :  { %2387 = vrcp.f32 %v1144_v30  ;;  %v1147_v16 = vpop.xlane.xlu0 %1146  ;;  %vm3407_vm14 = vcmp.eq.f32.partialorder %v475_v62, %v3121_v28  ;;  %v465_v30 = vmul.f32 0.125, %v449_v11 }
 0x4e5   :  { %2389 = vrcp.f32 %v1147_v16  ;;  %vm507_vm12 = vmand %vm3402_vm5, %vm3407_vm14 }
 0x4e6   :  { %v481_v7 = vfloor.f32 %v465_v30  ;;  %v1504_v30 = vld [vmem:[#allocation7 + $0x8] sm:$0xff] }
 0x4e7   :  { %v1150_v4 = vpop.xlane.xlu1 %1149 }
 0x4e8   :  { %2391 = vrcp.f32 %v1150_v4  ;;  %v1153_v52 = vpop.xlane.xlu0 %1152  ;;  %v1717_v4 = vadd.f32 -64.0, %v2705_v49 }
 0x4e9   :  { %2393 = vrcp.f32 %v1153_v52 }
 0x4ea   :  { %v2386_v43 = vpop.eup %2385  ;;  %v448_v22 = vadd.f32 0.5, %v1717_v4 }
 0x4eb   :  { %v1156_v16 = vpop.xlane.xlu1 %1155  ;;  %v1171_v31 = vmul.f32 %v2386_v43, %v3228_v59  ;;  %v446_v59 = vadd.f32 0.5, %v1715_v41  ;;  %v477_v43 = vfloor.f32 %v461_v37 }
 0x4ec   :  { %2395 = vrcp.f32 %v1156_v16  ;;  %v1159_v54 = vpop.xlane.xlu0 %1158 }
 0x4ed   :  { %2397 = vrcp.f32 %v1159_v54  ;;  %2106 = vmatprep.mubr.msk.f32.mxu0 %vm3644_vm1, %v1171_v31  ;;  %vm3386_vm1 = vmpackc.low %vm503_vm3, %vm502_vm11  ;;  %v462_v45 = vmul.f32 0.125, %v446_v59  ;;  %vm3467_vm14 = vcmp.eq.f32.partialorder %v477_v43, %v3121_v28  ;;  %v464_v54 = vmul.f32 0.125, %v448_v22 }
 0x4ee   :  { %v2388_v55 = vpop.eup %2387  ;;  %vm3694_vm11 = vmand %vm3318_vm10, %vm3337_vm7  ;;  %vm381_vm10 = vcmp.ge.f32.partialorder %v2686_v40, 64.0  ;;  %vm397_vm7 = vcmp.lt.f32.partialorder %v2686_v40, 96.0 }
 0x4ef   :  { %v2390_v29 = vpop.eup %2389  ;;  %v1172_v23 = vmul.f32 %v2388_v55, %v3232_v56  ;;  %v1162_v42 = vpop.xlane.xlu1 %1161  ;;  %vm3423_vm3 = vmpackc.low %vm3695_vm0, %vm3694_vm11  ;;  %vm3700_vm11 = vcmp.ge.f32.partialorder %v2684_v39, 64.0  ;;  %v478_v25 = vfloor.f32 %v462_v45 }
 0x4f0   :  { %2399 = vrcp.f32 %v1162_v42  ;;  %v1173_v56 = vmul.f32 %v2390_v29, %v3234_v2  ;;  %v463_v2 = vmul.f32 0.125, %v447_v18  ;;  %vm3450_vm0 = vmand %vm3700_vm11, %vm396_vm2 }
 0x4f1   :  { %2107 = vmatmul.mubr.msk.f32.vlgmr.msra.gmra.mrb[10].mxu0 %vm3698_vm6, %v1172_v23  ;;  %vm3462_vm5 = vmand %vm381_vm10, %vm397_vm7  ;;  %vm382_vm10 = vcmp.ge.f32.partialorder %v2699_v47, 64.0  ;;  %vm398_vm7 = vcmp.lt.f32.partialorder %v2699_v47, 96.0  ;;  %vm3511_vm11 = vcmp.eq.f32.partialorder %v478_v25, %v3121_v28  ;;  %v480_v47 = vfloor.f32 %v464_v54 }
 0x4f2   :  { %v2392_v26 = vpop.eup %2391  ;;  %2109 = vmatprep.mubr.msk.f32.mxu0 %vm3699_vm4, %v1173_v56  ;;  %2300 = vmatpush3.bf16.msk.msra.mxu0 %vm3270_vm15, %v2530_v34  ;;  %vm3455_vm15 = vcmp.eq.f32.partialorder %v476_v24, %v3121_v28  ;;  %vm3709_vm2 = vmmov %vm3699_vm4  ;;  %v479_v40 = vfloor.f32 %v463_v2 }
 0x4f3   :  { %v2394_v61 = vpop.eup %2393  ;;  %v1174_v16 = vmul.f32 %v2392_v26, %v3240_v38  ;;  %2302 = vmatprep.subr.msk.bf16.mxu0 %vm3386_vm1, %v2530_v34  ;;  %vm3477_vm6 = vmpackc.low %vm507_vm12, %vm506_vm9  ;;  %vm399_vm9 = vcmp.lt.f32.partialorder %v2701_v48, 96.0  ;;  %v1821_v48 = vld [vmem:[%s3637_s4] ss:$0 sm:$0xff] }
 0x4f4   :  { %v1175_v62 = vmul.f32 %v2394_v61, %v3242_v3  ;;  %vm3712_vm4 = vmmov %vm3709_vm2 }
 0x4f5   :  { %2110 = vmatmul.mubr.msk.f32.gmra.mrb[12].mxu0 %vm3709_vm2, %v1174_v16  ;;  %vm508_vm13 = vmand %vm3450_vm0, %vm3455_vm15  ;;  %vm385_vm0 = vcmp.ge.f32.partialorder %v2707_v50, 64.0  ;;  %vm401_vm15 = vcmp.lt.f32.partialorder %v2707_v50, 96.0  ;;  %v1720_v50 = vadd.f32 -64.0, %v2731_v58 }
 0x4f6   :  { %v2396_v37 = vpop.eup %2395  ;;  %2112 = vmatprep.mubr.msk.f32.mxu0 %vm3712_vm4, %v1175_v62  ;;  %2304 = vmatpush3.bf16.msk.msra.mxu0 %vm3386_vm1, %v2530_v34  ;;  %vm509_vm1 = vmand %vm3462_vm5, %vm3467_vm14  ;;  %vm3521_vm5 = vcmp.eq.f32.partialorder %v479_v40, %v3121_v28 }
 0x4f7   :  { %v2398_v59 = vpop.eup %2397  ;;  %v1176_v18 = vmul.f32 %v2396_v37, %v3248_v5  ;;  %2306 = vmatprep.subr.msk.bf16.mxu0 %vm3423_vm3, %v2530_v34  ;;  %vm3506_vm12 = vmand %vm382_vm10, %vm398_vm7  ;;  %vm384_vm7 = vcmp.ge.f32.partialorder %v2705_v49, 64.0  ;;  %v451_v23 = vadd.f32 0.5, %v1720_v50  ;;  %v1602_v50 = vld [vmem:[#allocation8] sm:$0xff] }
 0x4f8   :  { %v1177_v4 = vmul.f32 %v2398_v59, %v3250_v8  ;;  %vm3516_vm4 = vmand %vm383_vm8, %vm399_vm9  ;;  %vm400_vm8 = vcmp.lt.f32.partialorder %v2705_v49, 96.0  ;;  %v1719_v49 = vadd.f32 -64.0, %v2729_v57 }
 0x4f9   :  { %2113 = vmatmul.mubr.msk.f32.gmra.mrb[14].mxu0 %vm3709_vm2, %v1176_v18  ;;  %vm3721_vm14 = vmmov %vm3709_vm2  ;;  %v467_v21 = vmul.f32 0.125, %v451_v23  ;;  %v1604_v23 = vld [vmem:[#allocation8 + $0x10] sm:$0xff] }
 0x4fa   :  { %v2400_v14 = vpop.eup %2399  ;;  %2115 = vmatprep.mubr.msk.f32.mxu0 %vm3721_vm14, %v1177_v4  ;;  %2308 = vmatpush3.bf16.msk.msra.mxu0 %vm3423_vm3, %v2530_v34  ;;  %vm3534_vm10 = vmpackc.low %vm509_vm1, %vm508_vm13  ;;  %v1506_v4 = vld [vmem:[#allocation7 + $0x18] sm:$0xff] }
 0x4fb   :  { %v1178_v29 = vmul.f32 %v2400_v14, %v3256_v15  ;;  %2310 = vmatprep.subr.msk.bf16.mxu0 %vm3477_vm6, %v2530_v34  ;;  %vm510_vm3 = vmand %vm3506_vm12, %vm3511_vm11  ;;  %vm497_vm12 = vcmp.eq.f32.partialorder %v481_v7, %v3121_v28  ;;  %v450_v15 = vadd.f32 0.5, %v1719_v49  ;;  %v483_v24 = vfloor.f32 %v467_v21 }
 0x4fc   :  { %vm511_vm13 = vmand %vm3516_vm4, %vm3521_vm5 }
 0x4fd   :  { %vm3724_vm9 = vmmov %vm3709_vm2  ;;  %vm496_vm2 = vcmp.eq.f32.partialorder %v480_v47, %v3121_v28  ;;  %v466_v42 = vmul.f32 0.125, %v450_v15  ;;  %v1603_v15 = vld [vmem:[#allocation8 + $0x8] sm:$0xff] }
 0x4fe   :  { %2116 = vmatmul.mubr.msk.f32.gmra.mrb[16].mxu0 %vm3724_vm9, %v1178_v29  ;;  %vm416_vm1 = vmand %vm384_vm7, %vm400_vm8  ;;  %vm402_vm8 = vcmp.lt.f32.partialorder %v2729_v57, 96.0 }
 0x4ff   :  { %2312 = vmatpush3.bf16.msk.msra.mxu0 %vm3477_vm6, %v2530_v34  ;;  %vm417_vm14 = vmand %vm385_vm0, %vm401_vm15  ;;  %v482_v41 = vfloor.f32 %v466_v42  ;;  %vm386_vm6 = vcmp.ge.f32.partialorder %v2729_v57, 64.0  ;;  %v1605_v42 = vld [vmem:[#allocation8 + $0x18] sm:$0xff] }
 0x500   :  { %2314 = vmatprep.subr.msk.bf16.mxu0 %vm3534_vm10, %v2530_v34  ;;  %vm2317_vm11 = vmpackc.low %vm511_vm13, %vm510_vm3  ;;  %vm403_vm3 = vcmp.lt.f32.partialorder %v2731_v58, 96.0  ;;  %vm499_vm13 = vcmp.eq.f32.partialorder %v483_v24, %v3121_v28  ;;  %v2351_v21 = vpack.c.bf16 %v1605_v42, %v1604_v23 }
 0x501   :  { %vm512_vm4 = vmand %vm416_vm1, %vm496_vm2  ;;  %vm498_vm15 = vcmp.eq.f32.partialorder %v482_v41, %v3121_v28 }
 0x502   :  { %vm513_vm5 = vmand %vm417_vm14, %vm497_vm12  ;;  %vm144_vm12 = vcmp.eq.f32.partialorder %v3121_v28, %v2641_v6 }
 0x503   :  { %2316 = vmatpush3.bf16.msk.msra.mxu0 %vm3534_vm10, %v2530_v34  ;;  %vm2321_vm7 = vmpackc.low %vm513_vm5, %vm512_vm4  ;;  %vm387_vm10 = vcmp.ge.f32.partialorder %v2731_v58, 64.0  ;;  %vm3725_vm4 = vmmov 0   ;;  %vm3726_vm5 = vcmask 261120  }
 0x504   :  { %2318 = vmatprep.subr.msk.bf16.mxu0 %vm2317_vm11, %v2530_v34  ;;  %vm418_vm0 = vmand %vm386_vm6, %vm402_vm8 }
 0x505   :  { %vm419_vm9 = vmand %vm387_vm10, %vm403_vm3 }
 0x506   :  { %vm514_vm1 = vmand %vm418_vm0, %vm498_vm15 }
 0x507   :  { %2320 = vmatpush3.bf16.msk.msra.mxu0 %vm2317_vm11, %v2530_v34  ;;  %vm515_vm2 = vmand %vm419_vm9, %vm499_vm13  ;;  %vm1429_vm11 = vcmask 523264  }
 0x508   :  { %2322 = vmatprep.subr.msk.bf16.mxu0 %vm2321_vm7, %v2530_v34  ;;  %vm2325_vm14 = vmpackc.low %vm515_vm2, %vm514_vm1 }
 0x509   :  { %vm3728_vm6 = vmmov %vm3726_vm5 }
 0x50a   :  { %vm3729_vm10 = vmmov %vm3726_vm5 }
 0x50b   :  { %2324 = vmatpush3.bf16.msk.msra.mxu0 %vm2321_vm7, %v2530_v34  ;;  %vm3727_vm7 = vmmov %vm3726_vm5 }
 0x50c   :  { %2326 = vmatprep.subr.msk.bf16.mxu0 %vm2325_vm14, %v2530_v34  ;;  %vm3730_vm8 = vmmov %vm3726_vm5 }
 0x50f   :  { %2328 = vmatpush3.bf16.msk.msra.mxu0 %vm2325_vm14, %v2530_v34 }
 0x5c4   :  { %v2108_v56 = vpop.f32.mrb[10].mxu0 }
 0x5c5   :  { %v1309_v32 = vmul.f32 %v2108_v56, %v3137_v44  ;;  %v1269_v43 = vpop.f32.mrb[11].mxu0 }
 0x5c6   :  { %v1308_v57 = vmul.f32 %v1269_v43, %v3141_v53 }
 0x5c8   :  { %v2111_v58 = vpop.f32.mrb[12].mxu0  ;;  %2150 = vmatprep.mubr.f32.mxu0 %v1308_v57  ;;  %v1823_v57 = vld [vmem:[%s3639_s6] ss:$0 sm:$0xff] }
 0x5c9   :  { %v1311_v45 = vmul.f32 %v2111_v58, %v3157_v9  ;;  %v1279_v2 = vpop.f32.mrb[13].mxu0  ;;  %2151 = vmatmul.mubr.f32.vlgmr.msra.gmra.mrb[18].mxu0 %v1309_v32 }
 0x5ca   :  { %v1310_v22 = vmul.f32 %v1279_v2, %v3161_v10 }
 0x5cc   :  { %v2114_v26 = vpop.f32.mrb[14].mxu0  ;;  %2153 = vmatprep.mubr.f32.mxu0 %v1310_v22 }
 0x5cd   :  { %v1313_v11 = vmul.f32 %v2114_v26, %v3175_v36  ;;  %v1289_v61 = vpop.f32.mrb[15].mxu0  ;;  %2154 = vmatmul.mubr.f32.gmra.mrb[20].mxu0 %v1311_v45 }
 0x5ce   :  { %v1312_v34 = vmul.f32 %v1289_v61, %v3181_v46 }
 0x5d0   :  { %2156 = vmatprep.mubr.f32.mxu0 %v1312_v34 }
 0x5d1   :  { %v2117_v44 = vpop.f32.mrb[16].mxu0  ;;  %2157 = vmatmul.mubr.f32.gmra.mrb[22].mxu0 %v1313_v11 }
 0x5d2   :  { %v1315_v53 = vmul.f32 %v2117_v44, %v3191_v19  ;;  %v1299_v16 = vpop.f32.mrb[17].mxu0 }
 0x5d3   :  { %v1314_v9 = vmul.f32 %v1299_v16, %v3195_v51 }
 0x5d5   :  { %2159 = vmatprep.mubr.f32.mxu0 %v1314_v9 }
 0x5d6   :  { %2160 = vmatmul.mubr.f32.gmra.mrb[24].mxu0 %v1315_v53 }
 0x69c   :  { %v2152_v60 = vpop.f32.mrb[18].mxu0 }
 0x69d   :  { %v1422_v10 = vmul.f32 %v2152_v60, %v3135_v35  ;;  %v1382_v31 = vpop.f32.mrb[19].mxu0 }
 0x69e   :  { %v1421_v36 = vmul.f32 %v1382_v31, %v3132_v33 }
 0x6a0   :  { %v2330_v62 = vpack.c.bf16 %v1422_v10, %v1421_v36  ;;  %v2155_v38 = vpop.f32.mrb[20].mxu0 }
 0x6a1   :  { %v1424_v46 = vmul.f32 %v2155_v38, %v3155_v63  ;;  %v1392_v39 = vpop.f32.mrb[21].mxu0 }
 0x6a2   :  { %v1423_v25 = vmul.f32 %v1392_v39, %v3150_v20  ;;  %2331 = vmatpush3.bf16.msra.mxu1 %v2330_v62 }
 0x6a3   :  { %2332 = vmatprep.subr.bf16.mxu1 %v2527_v0 }
 0x6a4   :  { %v2333_v19 = vpack.c.bf16 %v1424_v46, %v1423_v25  ;;  %v2158_v51 = vpop.f32.mrb[22].mxu0 }
 0x6a5   :  { %v1426_v3 = vmul.f32 %v2158_v51, %v3166_v17  ;;  %v1402_v40 = vpop.f32.mrb[23].mxu0  ;;  %v1503_v17 = vld [vmem:[#allocation7] sm:$0xff] }
 0x6a6   :  { %v1425_v35 = vmul.f32 %v1402_v40, %v3171_v27  ;;  %2334 = vmatpush3.bf16.msra.mxu1 %v2333_v19  ;;  %v145_v27 = vsel %vm144_vm12, 1.0, %v2529_v1  ;;  %v2342_v18 = vpack.c.bf16 %v1504_v30, %v1503_v17 }
 0x6a7   :  { %2335 = vmatprep.subr.bf16.mxu1 %v2527_v0 }
 0x6a8   :  { %v2336_v33 = vpack.c.bf16 %v1426_v3, %v1425_v35 }
 0x6a9   :  { %v2161_v54 = vpop.f32.mrb[24].mxu0 }
 0x6aa   :  { %v1428_v63 = vmul.f32 %v2161_v54, %v3186_v12  ;;  %v1412_v37 = vpop.f32.mrb[25].mxu0  ;;  %2337 = vmatpush3.bf16.msra.mxu1 %v2336_v33  ;;  %v1505_v12 = vld [vmem:[#allocation7 + $0x10] sm:$0xff] }
 0x6ab   :  { %v1427_v20 = vmul.f32 %v1412_v37, %v3189_v13  ;;  %2338 = vmatprep.subr.bf16.mxu1 %v2527_v0  ;;  %v2345_v13 = vpack.c.bf16 %v1506_v4, %v1505_v12 }
 0x6ad   :  { %v2339_v59 = vpack.c.bf16 %v1428_v63, %v1427_v20 }
 0x6af   :  { %2340 = vmatpush3.bf16.msra.mxu1 %v2339_v59 }
 0x6b0   :  { %2341 = vmatprep.subr.bf16.mxu1 %v2527_v0 }
 0x6b2   :  { %2179 = vmatmul.mubr.msk.f32.vlgmr.msra.gmra.mrb[18].mxu1 %vm1429_vm11, %v145_v27 }
 0x6b3   :  { %2343 = vmatpush3.bf16.msra.mxu1 %v2342_v18  ;;  %2189 = vmatprep.mubr.msk.f32.mxu1 %vm3725_vm4, %v2529_v1 }
 0x6b4   :  { %2344 = vmatprep.subr.bf16.mxu1 %v2527_v0 }
 0x6b7   :  { %2346 = vmatpush3.bf16.msra.mxu1 %v2345_v13 }
 0x6b8   :  { %2347 = vmatprep.subr.bf16.mxu1 %v2527_v0 }
 0x785   :  { %v1499_v6 = vpop.f32.mrb[18].mxu1 }
 0x786   :  { %v2180_v28 = vpop.f32.mrb[19].mxu1  ;;  %2190 = vmatmul.mubr.msk.f32.vlgmr.msra.gmra.mrb[0].mxu1 %vm3726_vm5, %v1499_v6 }
 0x787   :  { %2200 = vmatprep.mubr.msk.f32.mxu1 %vm3725_vm4, %v2529_v1  ;;  %v2348_v1 = vpack.c.bf16 %v1603_v15, %v1602_v50 }
 0x789   :  { %2349 = vmatpush3.bf16.msra.mxu1 %v2348_v1 }
 0x78a   :  { %2350 = vmatprep.subr.bf16.mxu1 %v2527_v0 }
 0x78d   :  { %2352 = vmatpush3.bf16.msra.mxu1 %v2351_v21 }
 0x859   :  { %v1583_v5 = vpop.f32.mrb[0].mxu1 }
 0x85a   :  { %v1584_v55 = vadd.f32 %v1821_v48, %v1583_v5  ;;  %v2191_v8 = vpop.f32.mrb[1].mxu1 }
 0x85c   :  { %v1588_v47 = vsel %vm3727_vm7, %v1584_v55, 0.0 }
 0x85d   :  { %1589 = vadd.xlane.f32.xlu0 %v1588_v47 }
 0x8ea   :  { %v1590_v14 = vpop.xlane.xlu0 %1589 }
 0x8eb   :  { %v1592_v52 = vmul.f32 0.03125, %v1590_v14 }
 0x8ed   :  { %v1593_v7 = vsub.f32 %v1584_v55, %v1592_v52 }
 0x8ef   :  { %v1594_v29 = vmul.f32 %v1593_v7, %v1593_v7 }
 0x8f1   :  { %v1595_v49 = vsel %vm3728_vm6, %v1594_v29, 0.0 }
 0x8f2   :  { %1596 = vadd.xlane.f32.xlu1 %v1595_v49 }
 0x97f   :  { %v1597_v41 = vpop.xlane.xlu1 %1596 }
 0x980   :  { %v1598_v24 = vmul.f32 0.03125, %v1597_v41 }
 0x982   :  { %v1599_v56 = vadd.f32 1e-12, %v1598_v24 }
 0x984   :  { %2401 = vrsqrt.f32 %v1599_v56 }
 0x98e   :  { %v2402_v32 = vpop.eup %2401 }
 0x98f   :  { %v1601_v43 = vmul.f32 %v2402_v32, %v1593_v7 }
 0x991   :  { %2201 = vmatmul.mubr.msk.f32.vlgmr.msra.gmra.mrb[20].mxu1 %vm3729_vm10, %v1601_v43 }
 0xa64   :  { %v1682_v58 = vpop.f32.mrb[20].mxu1 }
 0xa65   :  { %v1683_v0 = vadd.f32 %v1823_v57, %v1682_v58  ;;  %v2202_v45 = vpop.f32.mrb[21].mxu1 }
 0xa67   :  { %1686 = vst.msk [vmem:[#allocation10] sm:$0xff] %vm3730_vm8, %v1683_v0 }
 0xa68   :  { %2502 = shalt.err (!%p2499_p8)
}
 0xa69   :  { %s2503_s9 = scalar_lea.hbm %s3640_s7, 128 }
 0xa6a   :  { %p2504_p9 = scmp.ne.s32.totalorder %s3640_s7, %s2503_s9  ;;  %p2507_p10 = scmp.lt.u32.totalorder %s2503_s9, %s3640_s7 }
 0xa6c   :  { %p2509_p11 = pnand %p2507_p10, %p2504_p9 }
 0xa6e   :  { %2512 = shalt.err (!%p2509_p11)
}
 0xa6f   :  { %1696 = dma.vmem_to_hbm [thread:$0]  %s1694_s28, 128, %s3640_s7, [#allocation4]  }
 0xa70   :  { %2519 = dma.done.wait [#allocation4], 128  }
 0xa71   :  { %2520 = vsyncadd [#allocation4], 4294967168 }
 0xa72   :  { %1700 = vsyncpa [#allocation3], 1 }
 0xa73   :  { %1701 = vsyncpa [#allocation6], 1 }
 0xa74   :  { %1702 = vsyncpa [#allocation9], 1 }
 0xa75   :  { %1703 = vsyncpa [#allocation4], 1 }

</bundles_post_ra>
